<compile_context>
chip_gen: v7x
topology: tpu7x:2x2x1
jax: 0.10.0
libtpu: 0.0.40
codegen_flags: <defaults>
</compile_context>

<pallas_src>
import jax
import jax.numpy as jnp
from jax.experimental import pallas as pl
from jax.experimental.pallas import tpu as pltpu

IN_FEATURES = 512
OUT_FEATURES = 512

# Shard the M grid axis across TensorCores (v7x megacore) only when the kernel
# is compute-bound enough that each core re-fetching the resident 1 MiB weight
# is noise; below this the kernel is weight-read / fixed-overhead bound.
_PARALLEL_M_THRESHOLD = 4096


def _linear_sub2_kernel(x_ref, wt_ref, b_ref, o_ref):
    # x_ref  : (TM, K) f32
    # wt_ref : (K,  N) f32  -- weight pre-transposed on host: plain [M,K]@[K,N]
    # b_ref  : (1,  N) f32  -- bias with the "- 2" already folded in
    # o_ref  : (TM, N) f32
    acc = jnp.dot(x_ref[...], wt_ref[...], preferred_element_type=jnp.float32)
    o_ref[...] = acc + b_ref[...]


def linear_sub2(x, weight, bias, *, tm=1024):
    """y = x @ weight.T + bias - 2, applied over the last axis of x."""
    orig_shape = x.shape
    assert orig_shape[-1] == IN_FEATURES
    x2d = x.reshape(-1, IN_FEATURES).astype(jnp.float32)
    M = x2d.shape[0]

    # One-time host prep: 1 MiB weight transpose to (K, N); fold -2 into bias.
    wt = jnp.asarray(weight, jnp.float32).T                      # (K, N)
    b2d = (jnp.asarray(bias, jnp.float32) - 2.0).reshape(1, OUT_FEATURES)

    # Tile selection:
    #   * small M  -> a single block of exactly M rows (full-dim block: legal
    #     even if M isn't 8-aligned, no padding, no wasted MXU work);
    #   * large M  -> TM-row tiles (multiple of 128); ragged last block is
    #     handled by Pallas, no host pad/slice.
    tm_eff = M if M <= tm else tm
    grid = (pl.cdiv(M, tm_eff),)

    dim_sem = ("parallel",) if M >= _PARALLEL_M_THRESHOLD else ("arbitrary",)

    flops = 2 * M * IN_FEATURES * OUT_FEATURES
    bytes_accessed = 4 * (
        M * IN_FEATURES                  # x (one pass)
        + IN_FEATURES * OUT_FEATURES     # weight (resident, one pass)
        + OUT_FEATURES                   # bias
        + M * OUT_FEATURES               # out (one pass)
    )

    def build(single_buffer_resident):
        # Constant-index (resident) operands gain nothing from double
        # buffering; Buffered(1) reclaims ~1 MiB VMEM.
        resident_kwargs = (
            dict(pipeline_mode=pl.Buffered(1)) if single_buffer_resident else {}
        )
        return pl.pallas_call(
            _linear_sub2_kernel,
            out_shape=jax.ShapeDtypeStruct((M, OUT_FEATURES), jnp.float32),
            grid=grid,
            in_specs=[
                # x tiles: default double-buffered along the M grid axis.
                pl.BlockSpec((tm_eff, IN_FEATURES), lambda i: (i, 0)),
                # weight / bias: constant block index -> VMEM-resident.
                pl.BlockSpec((IN_FEATURES, OUT_FEATURES), lambda i: (0, 0),
                             **resident_kwargs),
                pl.BlockSpec((1, OUT_FEATURES), lambda i: (0, 0),
                             **resident_kwargs),
            ],
            out_specs=pl.BlockSpec((tm_eff, OUT_FEATURES), lambda i: (i, 0)),
            compiler_params=pltpu.CompilerParams(
                dimension_semantics=dim_sem),
            cost_estimate=pl.CostEstimate(
                flops=flops, transcendentals=0,
                bytes_accessed=bytes_accessed),
        )

    try:
        out = build(single_buffer_resident=True)(x2d, wt, b2d)
    except Exception:
        # Defensive fallback: per-BlockSpec pipeline_mode support varies across
        # jax versions; default double-buffering is correct and fits VMEM.
        out = build(single_buffer_resident=False)(x2d, wt, b2d)

    return out.reshape(*orig_shape[:-1], OUT_FEATURES)


if __name__ == "__main__":
    key = jax.random.PRNGKey(0)
    kx, kw, kb = jax.random.split(key, 3)

    # Small input consistent with the module: batch=2, seq=8, hidden=512
    # (hidden fixed at 512 by nn.Linear(512, 512)).
    x = jax.random.normal(kx, (2, 8, IN_FEATURES), dtype=jnp.float32)

    # Deterministic parameter init (PyTorch-style uniform bound 1/sqrt(fan_in)).
    bound = 1.0 / (IN_FEATURES ** 0.5)
    weight = jax.random.uniform(
        kw, (OUT_FEATURES, IN_FEATURES), minval=-bound, maxval=bound,
        dtype=jnp.float32)
    bias = jax.random.uniform(
        kb, (OUT_FEATURES,), minval=-bound, maxval=bound, dtype=jnp.float32)

    y = linear_sub2(x, weight, bias)
    y = jax.block_until_ready(y)

    # Cross-check against plain-JAX reference.
    y_ref = jnp.einsum("bsk,nk->bsn", x, weight) + bias - 2.0
    assert y.shape == (2, 8, OUT_FEATURES)
    assert jnp.allclose(y, y_ref, atol=1e-4, rtol=1e-4)

    print("KERNEL_OK")
</pallas_src>

<mosaic_0001>
module attributes {stable_mosaic.version = 11 : i64} {
  func.func @_linear_sub2_kernel(%arg0: i32, %arg1: memref<16x512xf32, #tpu.memory_space<vmem>>, %arg2: memref<512x512xf32, #tpu.memory_space<vmem>>, %arg3: memref<1x512xf32, #tpu.memory_space<vmem>>, %arg4: memref<16x512xf32, #tpu.memory_space<vmem>>) attributes {dimension_semantics = [#tpu.dimension_semantics<arbitrary>], iteration_bounds = array<i64: 1>, scalar_prefetch = 0 : i64, scratch_operands = 0 : i64, tpu.core_type = #tpu.core_type<tc>, window_params = [{transform_indices = @transform_0, window_bounds = array<i64: 16, 512>}, {pipeline_mode = #tpu.pipeline_mode<synchronous>, transform_indices = @transform_1, window_bounds = array<i64: 512, 512>}, {pipeline_mode = #tpu.pipeline_mode<synchronous>, transform_indices = @transform_2, window_bounds = array<i64: 1, 512>}, {transform_indices = @transform_3, window_bounds = array<i64: 16, 512>}]} {
    %c0 = arith.constant 0 : index
    %c0_0 = arith.constant 0 : index
    %0 = vector.load %arg1[%c0, %c0_0] : memref<16x512xf32, #tpu.memory_space<vmem>>, vector<16x512xf32>
    %c0_1 = arith.constant 0 : index
    %c0_2 = arith.constant 0 : index
    %1 = vector.load %arg2[%c0_1, %c0_2] : memref<512x512xf32, #tpu.memory_space<vmem>>, vector<512x512xf32>
    %cst = arith.constant dense<0.000000e+00> : vector<16x512xf32>
    %2 = tpu.matmul %0, %1, %cst {dimension_numbers = #tpu.dot_dimension_numbers<[1], [0], [0], [1], [0, 0, 1, 1], [], []>} : vector<16x512xf32>, vector<512x512xf32>, vector<16x512xf32> -> vector<16x512xf32>
    %c0_3 = arith.constant 0 : index
    %c0_4 = arith.constant 0 : index
    %3 = vector.load %arg3[%c0_3, %c0_4] : memref<1x512xf32, #tpu.memory_space<vmem>>, vector<1x512xf32>
    %4 = vector.broadcast %3 : vector<1x512xf32> to vector<16x512xf32>
    %5 = arith.addf %2, %4 : vector<16x512xf32>
    %c0_5 = arith.constant 0 : index
    %c0_6 = arith.constant 0 : index
    %6 = vector.load %arg4[%c0_5, %c0_6] : memref<16x512xf32, #tpu.memory_space<vmem>>, vector<16x512xf32>
    tpu.vector_store %arg4[%c0_5, %c0_6], %5 {strides = array<i32>} : memref<16x512xf32, #tpu.memory_space<vmem>>, vector<16x512xf32>,
    return
  }
  func.func @transform_0(%arg0: i32) -> (i32, i32) {
    %c0_i32 = arith.constant 0 : i32
    %c0_i32_0 = arith.constant 0 : i32
    return %arg0, %c0_i32 : i32, i32
  }
  func.func @transform_1(%arg0: i32) -> (i32, i32) {
    %c0_i32 = arith.constant 0 : i32
    %c0_i32_0 = arith.constant 0 : i32
    %c0_i32_1 = arith.constant 0 : i32
    return %c0_i32, %c0_i32_0 : i32, i32
  }
  func.func @transform_2(%arg0: i32) -> (i32, i32) {
    %c0_i32 = arith.constant 0 : i32
    %c0_i32_0 = arith.constant 0 : i32
    %c0_i32_1 = arith.constant 0 : i32
    return %c0_i32, %c0_i32_0 : i32, i32
  }
  func.func @transform_3(%arg0: i32) -> (i32, i32) {
    %c0_i32 = arith.constant 0 : i32
    %c0_i32_0 = arith.constant 0 : i32
    return %arg0, %c0_i32 : i32, i32
  }
}

module attributes {stable_mosaic.version = 11 : i64} {
  func.func @_linear_sub2_kernel(%arg0: i32, %arg1: memref<16x512xf32, #tpu.memory_space<vmem>>, %arg2: memref<512x512xf32, #tpu.memory_space<vmem>>, %arg3: memref<1x512xf32, #tpu.memory_space<vmem>>, %arg4: memref<16x512xf32, #tpu.memory_space<vmem>>) attributes {dimension_semantics = [#tpu.dimension_semantics<arbitrary>], iteration_bounds = array<i64: 1>, scalar_prefetch = 0 : i64, scratch_operands = 0 : i64, tpu.core_type = #tpu.core_type<tc>, window_params = [{transform_indices = @transform_0, window_bounds = array<i64: 16, 512>}, {pipeline_mode = #tpu.pipeline_mode<synchronous>, transform_indices = @transform_1, window_bounds = array<i64: 512, 512>}, {pipeline_mode = #tpu.pipeline_mode<synchronous>, transform_indices = @transform_2, window_bounds = array<i64: 1, 512>}, {transform_indices = @transform_3, window_bounds = array<i64: 16, 512>}]} {
    %c0 = arith.constant 0 : index
    %c0_0 = arith.constant 0 : index
    %0 = vector.load %arg1[%c0, %c0_0] : memref<16x512xf32, #tpu.memory_space<vmem>>, vector<16x512xf32>
    %c0_1 = arith.constant 0 : index
    %c0_2 = arith.constant 0 : index
    %1 = vector.load %arg2[%c0_1, %c0_2] : memref<512x512xf32, #tpu.memory_space<vmem>>, vector<512x512xf32>
    %cst = arith.constant dense<0.000000e+00> : vector<16x512xf32>
    %2 = tpu.matmul %0, %1, %cst {dimension_numbers = #tpu.dot_dimension_numbers<[1], [0], [0], [1], [0, 0, 1, 1], [], []>} : vector<16x512xf32>, vector<512x512xf32>, vector<16x512xf32> -> vector<16x512xf32>
    %c0_3 = arith.constant 0 : index
    %c0_4 = arith.constant 0 : index
    %3 = vector.load %arg3[%c0_3, %c0_4] : memref<1x512xf32, #tpu.memory_space<vmem>>, vector<1x512xf32>
    %4 = vector.broadcast %3 : vector<1x512xf32> to vector<16x512xf32>
    %5 = arith.addf %2, %4 : vector<16x512xf32>
    %c0_5 = arith.constant 0 : index
    %c0_6 = arith.constant 0 : index
    %6 = vector.load %arg4[%c0_5, %c0_6] : memref<16x512xf32, #tpu.memory_space<vmem>>, vector<16x512xf32>
    tpu.vector_store %arg4[%c0_5, %c0_6], %5 {strides = array<i32>} : memref<16x512xf32, #tpu.memory_space<vmem>>, vector<16x512xf32>,
    return
  }
  func.func @transform_0(%arg0: i32) -> (i32, i32) {
    %c0_i32 = arith.constant 0 : i32
    %c0_i32_0 = arith.constant 0 : i32
    return %arg0, %c0_i32 : i32, i32
  }
  func.func @transform_1(%arg0: i32) -> (i32, i32) {
    %c0_i32 = arith.constant 0 : i32
    %c0_i32_0 = arith.constant 0 : i32
    %c0_i32_1 = arith.constant 0 : i32
    return %c0_i32, %c0_i32_0 : i32, i32
  }
  func.func @transform_2(%arg0: i32) -> (i32, i32) {
    %c0_i32 = arith.constant 0 : i32
    %c0_i32_0 = arith.constant 0 : i32
    %c0_i32_1 = arith.constant 0 : i32
    return %c0_i32, %c0_i32_0 : i32, i32
  }
  func.func @transform_3(%arg0: i32) -> (i32, i32) {
    %c0_i32 = arith.constant 0 : i32
    %c0_i32_0 = arith.constant 0 : i32
    return %arg0, %c0_i32 : i32, i32
  }
}

</mosaic_0001>

<bundles_post_ra>
// kernel: tpu_custom_call.1
= control target key start
LH: loop header
LB: loop body
LE: loop exit
PB: predicated region body
PF: predicated region fallthrough
CT: control target
= control target key end

     0   :  { %8 = vsyncpa [#allocation3], 0  ;;  %s1085_s0 = inlined_call_operand.hbm [shape: f32[16,512], index: 0, kind: input, shape index: {}]   ;;  %s1086_s1 = inlined_call_operand.hbm [shape: f32[512,512], index: 1, kind: input, shape index: {}]   ;;  %s1087_s2 = inlined_call_operand.vmem [shape: f32[1,512], index: 2, kind: input, shape index: {}]   ;;  %s1088_s3 = inlined_call_operand.hbm [shape: f32[16,512], index: 3, kind: output, shape index: {}]  }
   0x1   :  { %9 = vsyncpa [#allocation6], 0 }
   0x2   :  { %10 = vsyncpa [#allocation4], 0  ;;  %s1012_s12 = smov [#allocation2]   ;;  %s940_s16 = scalar_lea.hbm %s1085_s0, 1024 }
   0x3   :  { %s16_s13 = sshll.u32 %s1012_s12, 4  ;;  %p941_p0 = scmp.ne.s32.totalorder %s1085_s0, %s940_s16  ;;  %s17_s13 = int_to_ptr.vmem [resolvable:$true] %s16_s13 }
   0x4   :  { %p944_p1 = scmp.lt.u32.totalorder %s940_s16, %s1085_s0 }
   0x6   :  { %p946_p2 = pnand %p944_p1, %p941_p0 }
   0x8   :  { %949 = shalt.err (!%p946_p2)
}
   0x9   :  { %s950_s21 = scalar_lea.vmem %s17_s13, 1024  ;;  %p955_p4 = scmp.lt.s32.totalorder %s17_s13, %s17_s13 }
   0xa   :  { %p951_p3 = scmp.ne.s32.totalorder %s17_s13, %s950_s21  ;;  %p956_p5 = scmp.lt.s32.totalorder %s950_s21, %s950_s21 }
   0xc   :  { %p957_p6 = por %p956_p5, %p955_p4 }
   0xe   :  { %p958_p7 = pnand %p957_p6, %p951_p3 }
  0x10   :  { %961 = shalt.err (!%p958_p7)
}
  0x11   :  { %s1013_s22 = smov 512   ;;  %s1014_s23 = smov 32  }
  0x12   :  { %22 = dma.hbm_to_vmem [thread:$0]  %s1085_s0, 1024, %s17_s13, [#allocation3], %s1013_s22, %s1013_s22, %s1014_s23  }
  0x13   :  { %s1015_s26 = smov [#allocation5]   ;;  %s962_s30 = scalar_lea.hbm %s1086_s1, 32768 }
  0x14   :  { %s28_s27 = sshll.u32 %s1015_s26, 4  ;;  %p963_p8 = scmp.ne.s32.totalorder %s1086_s1, %s962_s30  ;;  %s29_s27 = int_to_ptr.vmem [resolvable:$true] %s28_s27 }
  0x15   :  { %p966_p9 = scmp.lt.u32.totalorder %s962_s30, %s1086_s1 }
  0x17   :  { %p968_p10 = pnand %p966_p9, %p963_p8 }
  0x19   :  { %971 = shalt.err (!%p968_p10)
}
  0x1a   :  { %s972_s8 = scalar_lea.vmem %s29_s27, 32768  ;;  %p977_p12 = scmp.lt.s32.totalorder %s29_s27, %s29_s27 }
  0x1b   :  { %p973_p11 = scmp.ne.s32.totalorder %s29_s27, %s972_s8  ;;  %p978_p13 = scmp.lt.s32.totalorder %s972_s8, %s972_s8 }
  0x1d   :  { %p979_p0 = por %p978_p13, %p977_p12 }
  0x1f   :  { %p980_p1 = pnand %p979_p0, %p973_p11 }
  0x21   :  { %983 = shalt.err (!%p980_p1)
}
  0x22   :  { %34 = dma.hbm_to_vmem [thread:$0]  %s1086_s1, 32768, %s29_s27, [#allocation6], %s1013_s22, %s1013_s22, %s1014_s23  }
  0x23   :  { %1006 = dma.done.wait [#allocation3], 1024  }
  0x24   :  { %1007 = vsyncadd [#allocation3], 4294966272 }
  0x25   :  { %1008 = dma.done.wait [#allocation6], 32768  }
  0x26   :  { %1009 = vsyncadd [#allocation6], 4294934528  ;;  %v52_v0 = vld [vmem:[#allocation5 + $0x8] sm:$0xff]  ;;  %v54_v2 = vld [vmem:[#allocation5 + $0x18] sm:$0xff] }
  0x27   :  { %v56_v1 = vld [vmem:[#allocation5 + $0x28] sm:$0xff]  ;;  %v58_v4 = vld [vmem:[#allocation5 + $0x38] sm:$0xff]  ;;  %v51_v5 = vld [vmem:[#allocation5] sm:$0xff] }
  0x28   :  { %v663_v3 = vpack.c.bf16 %v56_v1, %v52_v0  ;;  %v55_v6 = vld [vmem:[#allocation5 + $0x20] sm:$0xff]  ;;  %v791_v7 = vpack.c.bf16 %v58_v4, %v54_v2  ;;  %v53_v9 = vld [vmem:[#allocation5 + $0x10] sm:$0xff]  ;;  %v60_v11 = vld [vmem:[#allocation5 + $0x48] sm:$0xff] }
  0x29   :  { %v665_v8 = vpack.c.bf16 %v55_v6, %v51_v5  ;;  %v57_v10 = vld [vmem:[#allocation5 + $0x30] sm:$0xff]  ;;  %v64_v13 = vld [vmem:[#allocation5 + $0x68] sm:$0xff]  ;;  %v62_v14 = vld [vmem:[#allocation5 + $0x58] sm:$0xff] }
  0x2a   :  { %664 = vmatprep.subr.bf16.mxu0 %v663_v3  ;;  %v793_v12 = vpack.c.bf16 %v57_v10, %v53_v9  ;;  %v66_v15 = vld [vmem:[#allocation5 + $0x78] sm:$0xff]  ;;  %792 = vmatprep.subr.bf16.mxu1 %v791_v7  ;;  %v667_v16 = vpack.c.bf16 %v64_v13, %v60_v11  ;;  %v59_v18 = vld [vmem:[#allocation5 + $0x40] sm:$0xff]  ;;  %v61_v20 = vld [vmem:[#allocation5 + $0x50] sm:$0xff] }
  0x2b   :  { %666 = vmatpush1.bf16.msra.mxu0 %v665_v8  ;;  %v795_v17 = vpack.c.bf16 %v66_v15, %v62_v14  ;;  %v63_v19 = vld [vmem:[#allocation5 + $0x60] sm:$0xff]  ;;  %v65_v22 = vld [vmem:[#allocation5 + $0x70] sm:$0xff]  ;;  %v68_v23 = vld [vmem:[#allocation5 + $0x88] sm:$0xff] }
  0x2c   :  { %794 = vmatpush1.bf16.msra.mxu1 %v793_v12  ;;  %v669_v21 = vpack.c.bf16 %v63_v19, %v59_v18  ;;  %v72_v24 = vld [vmem:[#allocation5 + $0xa8] sm:$0xff]  ;;  %668 = vmatprep.subr.bf16.mxu0 %v667_v16  ;;  %v797_v25 = vpack.c.bf16 %v65_v22, %v61_v20  ;;  %v70_v27 = vld [vmem:[#allocation5 + $0x98] sm:$0xff]  ;;  %v67_v29 = vld [vmem:[#allocation5 + $0x80] sm:$0xff] }
  0x2d   :  { %796 = vmatprep.subr.bf16.mxu1 %v795_v17  ;;  %v671_v26 = vpack.c.bf16 %v72_v24, %v68_v23  ;;  %v74_v28 = vld [vmem:[#allocation5 + $0xb8] sm:$0xff]  ;;  %v71_v31 = vld [vmem:[#allocation5 + $0xa0] sm:$0xff]  ;;  %v69_v32 = vld [vmem:[#allocation5 + $0x90] sm:$0xff] }
  0x2e   :  { %v799_v30 = vpack.c.bf16 %v74_v28, %v70_v27  ;;  %v73_v33 = vld [vmem:[#allocation5 + $0xb0] sm:$0xff]  ;;  %v673_v34 = vpack.c.bf16 %v71_v31, %v67_v29  ;;  %v76_v35 = vld [vmem:[#allocation5 + $0xc8] sm:$0xff]  ;;  %v78_v37 = vld [vmem:[#allocation5 + $0xd8] sm:$0xff] }
  0x2f   :  { %670 = vmatpush1.bf16.msra.mxu0 %v669_v21  ;;  %v80_v36 = vld [vmem:[#allocation5 + $0xe8] sm:$0xff]  ;;  %v801_v38 = vpack.c.bf16 %v73_v33, %v69_v32  ;;  %v82_v40 = vld [vmem:[#allocation5 + $0xf8] sm:$0xff]  ;;  %v75_v41 = vld [vmem:[#allocation5 + $0xc0] sm:$0xff] }
  0x30   :  { %798 = vmatpush1.bf16.msra.mxu1 %v797_v25  ;;  %672 = vmatprep.subr.bf16.mxu0 %v671_v26  ;;  %v675_v39 = vpack.c.bf16 %v80_v36, %v76_v35  ;;  %v79_v42 = vld [vmem:[#allocation5 + $0xe0] sm:$0xff]  ;;  %v803_v43 = vpack.c.bf16 %v82_v40, %v78_v37  ;;  %v77_v44 = vld [vmem:[#allocation5 + $0xd0] sm:$0xff]  ;;  %v84_v46 = vld [vmem:[#allocation5 + $0x108] sm:$0xff] }
  0x31   :  { %800 = vmatprep.subr.bf16.mxu1 %v799_v30  ;;  %v81_v45 = vld [vmem:[#allocation5 + $0xf0] sm:$0xff]  ;;  %v88_v47 = vld [vmem:[#allocation5 + $0x128] sm:$0xff]  ;;  %v86_v48 = vld [vmem:[#allocation5 + $0x118] sm:$0xff]  ;;  %v677_v50 = vpack.c.bf16 %v79_v42, %v75_v41 }
  0x32   :  { %v90_v49 = vld [vmem:[#allocation5 + $0x138] sm:$0xff]  ;;  %v805_v51 = vpack.c.bf16 %v81_v45, %v77_v44  ;;  %v679_v52 = vpack.c.bf16 %v88_v47, %v84_v46  ;;  %v83_v53 = vld [vmem:[#allocation5 + $0x100] sm:$0xff]  ;;  %v85_v55 = vld [vmem:[#allocation5 + $0x110] sm:$0xff] }
  0x33   :  { %674 = vmatpush1.bf16.msra.mxu0 %v673_v34  ;;  %v87_v54 = vld [vmem:[#allocation5 + $0x120] sm:$0xff]  ;;  %v807_v56 = vpack.c.bf16 %v90_v49, %v86_v48  ;;  %v89_v57 = vld [vmem:[#allocation5 + $0x130] sm:$0xff]  ;;  %v92_v58 = vld [vmem:[#allocation5 + $0x148] sm:$0xff] }
  0x34   :  { %802 = vmatpush1.bf16.msra.mxu1 %v801_v38  ;;  %676 = vmatprep.subr.bf16.mxu0 %v675_v39  ;;  %v96_v59 = vld [vmem:[#allocation5 + $0x168] sm:$0xff]  ;;  %v94_v60 = vld [vmem:[#allocation5 + $0x158] sm:$0xff]  ;;  %v681_v62 = vpack.c.bf16 %v87_v54, %v83_v53  ;;  %v809_v63 = vpack.c.bf16 %v89_v57, %v85_v55  ;;  %v91_v1 = vld [vmem:[#allocation5 + $0x140] sm:$0xff] }
  0x35   :  { %804 = vmatprep.subr.bf16.mxu1 %v803_v43  ;;  %v98_v61 = vld [vmem:[#allocation5 + $0x178] sm:$0xff]  ;;  %v683_v0 = vpack.c.bf16 %v96_v59, %v92_v58  ;;  %v95_v2 = vld [vmem:[#allocation5 + $0x160] sm:$0xff]  ;;  %v93_v3 = vld [vmem:[#allocation5 + $0x150] sm:$0xff] }
  0x36   :  { %v811_v4 = vpack.c.bf16 %v98_v61, %v94_v60  ;;  %v97_v5 = vld [vmem:[#allocation5 + $0x170] sm:$0xff]  ;;  %v100_v6 = vld [vmem:[#allocation5 + $0x188] sm:$0xff]  ;;  %v102_v8 = vld [vmem:[#allocation5 + $0x198] sm:$0xff]  ;;  %v685_v10 = vpack.c.bf16 %v95_v2, %v91_v1 }
  0x37   :  { %678 = vmatpush1.bf16.msra.mxu0 %v677_v50  ;;  %v104_v7 = vld [vmem:[#allocation5 + $0x1a8] sm:$0xff]  ;;  %v106_v9 = vld [vmem:[#allocation5 + $0x1b8] sm:$0xff]  ;;  %v813_v11 = vpack.c.bf16 %v97_v5, %v93_v3  ;;  %v99_v13 = vld [vmem:[#allocation5 + $0x180] sm:$0xff] }
  0x38   :  { %806 = vmatpush1.bf16.msra.mxu1 %v805_v51  ;;  %680 = vmatprep.subr.bf16.mxu0 %v679_v52  ;;  %v687_v12 = vpack.c.bf16 %v104_v7, %v100_v6  ;;  %v103_v14 = vld [vmem:[#allocation5 + $0x1a0] sm:$0xff]  ;;  %v101_v15 = vld [vmem:[#allocation5 + $0x190] sm:$0xff]  ;;  %v815_v16 = vpack.c.bf16 %v106_v9, %v102_v8  ;;  %v108_v18 = vld [vmem:[#allocation5 + $0x1c8] sm:$0xff] }
  0x39   :  { %808 = vmatprep.subr.bf16.mxu1 %v807_v56  ;;  %v105_v17 = vld [vmem:[#allocation5 + $0x1b0] sm:$0xff]  ;;  %v112_v19 = vld [vmem:[#allocation5 + $0x1e8] sm:$0xff]  ;;  %v110_v20 = vld [vmem:[#allocation5 + $0x1d8] sm:$0xff]  ;;  %v689_v22 = vpack.c.bf16 %v103_v14, %v99_v13 }
  0x3a   :  { %v114_v21 = vld [vmem:[#allocation5 + $0x1f8] sm:$0xff]  ;;  %v817_v23 = vpack.c.bf16 %v105_v17, %v101_v15  ;;  %v691_v24 = vpack.c.bf16 %v112_v19, %v108_v18  ;;  %v107_v25 = vld [vmem:[#allocation5 + $0x1c0] sm:$0xff]  ;;  %v109_v27 = vld [vmem:[#allocation5 + $0x1d0] sm:$0xff] }
  0x3b   :  { %682 = vmatpush1.bf16.msra.mxu0 %v681_v62  ;;  %v111_v26 = vld [vmem:[#allocation5 + $0x1e0] sm:$0xff]  ;;  %v819_v28 = vpack.c.bf16 %v114_v21, %v110_v20  ;;  %v113_v29 = vld [vmem:[#allocation5 + $0x1f0] sm:$0xff]  ;;  %v116_v30 = vld [vmem:[#allocation5 + $0x208] sm:$0xff] }
  0x3c   :  { %810 = vmatpush1.bf16.msra.mxu1 %v809_v63  ;;  %684 = vmatprep.subr.bf16.mxu0 %v683_v0  ;;  %v120_v31 = vld [vmem:[#allocation5 + $0x228] sm:$0xff]  ;;  %v118_v32 = vld [vmem:[#allocation5 + $0x218] sm:$0xff]  ;;  %v693_v34 = vpack.c.bf16 %v111_v26, %v107_v25  ;;  %v821_v35 = vpack.c.bf16 %v113_v29, %v109_v27  ;;  %v115_v37 = vld [vmem:[#allocation5 + $0x200] sm:$0xff] }
  0x3d   :  { %812 = vmatprep.subr.bf16.mxu1 %v811_v4  ;;  %v122_v33 = vld [vmem:[#allocation5 + $0x238] sm:$0xff]  ;;  %v695_v36 = vpack.c.bf16 %v120_v31, %v116_v30  ;;  %v119_v38 = vld [vmem:[#allocation5 + $0x220] sm:$0xff]  ;;  %v117_v39 = vld [vmem:[#allocation5 + $0x210] sm:$0xff] }
  0x3e   :  { %v823_v40 = vpack.c.bf16 %v122_v33, %v118_v32  ;;  %v121_v41 = vld [vmem:[#allocation5 + $0x230] sm:$0xff]  ;;  %v124_v42 = vld [vmem:[#allocation5 + $0x248] sm:$0xff]  ;;  %v126_v44 = vld [vmem:[#allocation5 + $0x258] sm:$0xff]  ;;  %v697_v46 = vpack.c.bf16 %v119_v38, %v115_v37 }
  0x3f   :  { %686 = vmatpush1.bf16.msra.mxu0 %v685_v10  ;;  %v128_v43 = vld [vmem:[#allocation5 + $0x268] sm:$0xff]  ;;  %v130_v45 = vld [vmem:[#allocation5 + $0x278] sm:$0xff]  ;;  %v825_v47 = vpack.c.bf16 %v121_v41, %v117_v39  ;;  %v123_v49 = vld [vmem:[#allocation5 + $0x240] sm:$0xff] }
  0x40   :  { %814 = vmatpush1.bf16.msra.mxu1 %v813_v11  ;;  %688 = vmatprep.subr.bf16.mxu0 %v687_v12  ;;  %v699_v48 = vpack.c.bf16 %v128_v43, %v124_v42  ;;  %v127_v50 = vld [vmem:[#allocation5 + $0x260] sm:$0xff]  ;;  %v125_v51 = vld [vmem:[#allocation5 + $0x250] sm:$0xff]  ;;  %v827_v52 = vpack.c.bf16 %v130_v45, %v126_v44  ;;  %v132_v54 = vld [vmem:[#allocation5 + $0x288] sm:$0xff] }
  0x41   :  { %816 = vmatprep.subr.bf16.mxu1 %v815_v16  ;;  %v129_v53 = vld [vmem:[#allocation5 + $0x270] sm:$0xff]  ;;  %v136_v55 = vld [vmem:[#allocation5 + $0x2a8] sm:$0xff]  ;;  %v134_v56 = vld [vmem:[#allocation5 + $0x298] sm:$0xff]  ;;  %v701_v58 = vpack.c.bf16 %v127_v50, %v123_v49 }
  0x42   :  { %v138_v57 = vld [vmem:[#allocation5 + $0x2b8] sm:$0xff]  ;;  %v829_v59 = vpack.c.bf16 %v129_v53, %v125_v51  ;;  %v703_v60 = vpack.c.bf16 %v136_v55, %v132_v54  ;;  %v131_v61 = vld [vmem:[#allocation5 + $0x280] sm:$0xff]  ;;  %v133_v63 = vld [vmem:[#allocation5 + $0x290] sm:$0xff] }
  0x43   :  { %690 = vmatpush1.bf16.msra.mxu0 %v689_v22  ;;  %v135_v62 = vld [vmem:[#allocation5 + $0x2a0] sm:$0xff]  ;;  %v831_v0 = vpack.c.bf16 %v138_v57, %v134_v56  ;;  %v137_v1 = vld [vmem:[#allocation5 + $0x2b0] sm:$0xff]  ;;  %v140_v2 = vld [vmem:[#allocation5 + $0x2c8] sm:$0xff] }
  0x44   :  { %818 = vmatpush1.bf16.msra.mxu1 %v817_v23  ;;  %692 = vmatprep.subr.bf16.mxu0 %v691_v24  ;;  %v144_v3 = vld [vmem:[#allocation5 + $0x2e8] sm:$0xff]  ;;  %v142_v4 = vld [vmem:[#allocation5 + $0x2d8] sm:$0xff]  ;;  %v705_v6 = vpack.c.bf16 %v135_v62, %v131_v61  ;;  %v139_v7 = vld [vmem:[#allocation5 + $0x2c0] sm:$0xff]  ;;  %v833_v8 = vpack.c.bf16 %v137_v1, %v133_v63 }
  0x45   :  { %820 = vmatprep.subr.bf16.mxu1 %v819_v28  ;;  %v146_v5 = vld [vmem:[#allocation5 + $0x2f8] sm:$0xff]  ;;  %v707_v9 = vpack.c.bf16 %v144_v3, %v140_v2  ;;  %v143_v10 = vld [vmem:[#allocation5 + $0x2e0] sm:$0xff]  ;;  %v141_v11 = vld [vmem:[#allocation5 + $0x2d0] sm:$0xff] }
  0x46   :  { %v145_v12 = vld [vmem:[#allocation5 + $0x2f0] sm:$0xff]  ;;  %v835_v13 = vpack.c.bf16 %v146_v5, %v142_v4  ;;  %v148_v14 = vld [vmem:[#allocation5 + $0x308] sm:$0xff]  ;;  %v150_v17 = vld [vmem:[#allocation5 + $0x318] sm:$0xff]  ;;  %v709_v19 = vpack.c.bf16 %v143_v10, %v139_v7 }
  0x47   :  { %694 = vmatpush1.bf16.msra.mxu0 %v693_v34  ;;  %v152_v15 = vld [vmem:[#allocation5 + $0x328] sm:$0xff]  ;;  %v154_v18 = vld [vmem:[#allocation5 + $0x338] sm:$0xff]  ;;  %v837_v20 = vpack.c.bf16 %v145_v12, %v141_v11  ;;  %v147_v22 = vld [vmem:[#allocation5 + $0x300] sm:$0xff] }
  0x48   :  { %822 = vmatpush1.bf16.msra.mxu1 %v821_v35  ;;  %696 = vmatprep.subr.bf16.mxu0 %v695_v36  ;;  %v44_v16 = vld [vmem:[#allocation2 + $0x8] sm:$0xff]  ;;  %v711_v21 = vpack.c.bf16 %v152_v15, %v148_v14  ;;  %v151_v23 = vld [vmem:[#allocation5 + $0x320] sm:$0xff]  ;;  %v149_v24 = vld [vmem:[#allocation5 + $0x310] sm:$0xff]  ;;  %v839_v25 = vpack.c.bf16 %v154_v18, %v150_v17 }
  0x49   :  { %824 = vmatprep.subr.bf16.mxu1 %v823_v40  ;;  %393 = vmatprep.mubr.f32.mxu0 %v44_v16  ;;  %v153_v26 = vld [vmem:[#allocation5 + $0x330] sm:$0xff]  ;;  %v156_v27 = vld [vmem:[#allocation5 + $0x348] sm:$0xff]  ;;  %v158_v29 = vld [vmem:[#allocation5 + $0x358] sm:$0xff]  ;;  %v713_v31 = vpack.c.bf16 %v151_v23, %v147_v22 }
  0x4a   :  { %547 = vmatprep.mubr.f32.mxu1 %v44_v16  ;;  %v160_v28 = vld [vmem:[#allocation5 + $0x368] sm:$0xff]  ;;  %v162_v30 = vld [vmem:[#allocation5 + $0x378] sm:$0xff]  ;;  %v841_v32 = vpack.c.bf16 %v153_v26, %v149_v24  ;;  %v155_v34 = vld [vmem:[#allocation5 + $0x340] sm:$0xff] }
  0x4b   :  { %698 = vmatpush1.bf16.msra.mxu0 %v697_v46  ;;  %v715_v33 = vpack.c.bf16 %v160_v28, %v156_v27  ;;  %v159_v35 = vld [vmem:[#allocation5 + $0x360] sm:$0xff]  ;;  %v157_v36 = vld [vmem:[#allocation5 + $0x350] sm:$0xff]  ;;  %v843_v37 = vpack.c.bf16 %v162_v30, %v158_v29  ;;  %v164_v39 = vld [vmem:[#allocation5 + $0x388] sm:$0xff] }
  0x4c   :  { %826 = vmatpush1.bf16.msra.mxu1 %v825_v47  ;;  %700 = vmatprep.subr.bf16.mxu0 %v699_v48  ;;  %v161_v38 = vld [vmem:[#allocation5 + $0x370] sm:$0xff]  ;;  %v168_v40 = vld [vmem:[#allocation5 + $0x3a8] sm:$0xff]  ;;  %v166_v41 = vld [vmem:[#allocation5 + $0x398] sm:$0xff]  ;;  %v717_v43 = vpack.c.bf16 %v159_v35, %v155_v34 }
  0x4d   :  { %828 = vmatprep.subr.bf16.mxu1 %v827_v52  ;;  %v170_v42 = vld [vmem:[#allocation5 + $0x3b8] sm:$0xff]  ;;  %v845_v44 = vpack.c.bf16 %v161_v38, %v157_v36  ;;  %v719_v45 = vpack.c.bf16 %v168_v40, %v164_v39  ;;  %v163_v46 = vld [vmem:[#allocation5 + $0x380] sm:$0xff]  ;;  %v165_v48 = vld [vmem:[#allocation5 + $0x390] sm:$0xff] }
  0x4e   :  { %v167_v47 = vld [vmem:[#allocation5 + $0x3a0] sm:$0xff]  ;;  %v847_v49 = vpack.c.bf16 %v170_v42, %v166_v41  ;;  %v169_v50 = vld [vmem:[#allocation5 + $0x3b0] sm:$0xff]  ;;  %v172_v51 = vld [vmem:[#allocation5 + $0x3c8] sm:$0xff] }
  0x4f   :  { %702 = vmatpush1.bf16.msra.mxu0 %v701_v58  ;;  %v176_v52 = vld [vmem:[#allocation5 + $0x3e8] sm:$0xff]  ;;  %v174_v53 = vld [vmem:[#allocation5 + $0x3d8] sm:$0xff]  ;;  %v721_v55 = vpack.c.bf16 %v167_v47, %v163_v46  ;;  %v849_v56 = vpack.c.bf16 %v169_v50, %v165_v48  ;;  %v171_v58 = vld [vmem:[#allocation5 + $0x3c0] sm:$0xff] }
  0x50   :  { %830 = vmatpush1.bf16.msra.mxu1 %v829_v59  ;;  %704 = vmatprep.subr.bf16.mxu0 %v703_v60  ;;  %v178_v54 = vld [vmem:[#allocation5 + $0x3f8] sm:$0xff]  ;;  %v723_v57 = vpack.c.bf16 %v176_v52, %v172_v51  ;;  %v175_v59 = vld [vmem:[#allocation5 + $0x3e0] sm:$0xff]  ;;  %v173_v60 = vld [vmem:[#allocation5 + $0x3d0] sm:$0xff] }
  0x51   :  { %832 = vmatprep.subr.bf16.mxu1 %v831_v0  ;;  %v851_v61 = vpack.c.bf16 %v178_v54, %v174_v53  ;;  %v177_v62 = vld [vmem:[#allocation5 + $0x3f0] sm:$0xff]  ;;  %v180_v63 = vld [vmem:[#allocation5 + $0x408] sm:$0xff]  ;;  %v182_v1 = vld [vmem:[#allocation5 + $0x418] sm:$0xff]  ;;  %v725_v3 = vpack.c.bf16 %v175_v59, %v171_v58 }
  0x52   :  { %v184_v0 = vld [vmem:[#allocation5 + $0x428] sm:$0xff]  ;;  %v186_v2 = vld [vmem:[#allocation5 + $0x438] sm:$0xff]  ;;  %v853_v4 = vpack.c.bf16 %v177_v62, %v173_v60  ;;  %v183_v7 = vld [vmem:[#allocation5 + $0x420] sm:$0xff] }
  0x53   :  { %706 = vmatpush1.bf16.msra.mxu0 %v705_v6  ;;  %v727_v5 = vpack.c.bf16 %v184_v0, %v180_v63  ;;  %v179_v6 = vld [vmem:[#allocation5 + $0x400] sm:$0xff]  ;;  %v185_v10 = vld [vmem:[#allocation5 + $0x430] sm:$0xff]  ;;  %v188_v11 = vld [vmem:[#allocation5 + $0x448] sm:$0xff] }
  0x54   :  { %834 = vmatpush1.bf16.msra.mxu1 %v833_v8  ;;  %708 = vmatprep.subr.bf16.mxu0 %v707_v9  ;;  %v181_v8 = vld [vmem:[#allocation5 + $0x410] sm:$0xff]  ;;  %v855_v9 = vpack.c.bf16 %v186_v2, %v182_v1  ;;  %v192_v12 = vld [vmem:[#allocation5 + $0x468] sm:$0xff]  ;;  %v194_v14 = vld [vmem:[#allocation5 + $0x478] sm:$0xff]  ;;  %v729_v16 = vpack.c.bf16 %v183_v7, %v179_v6 }
  0x55   :  { %836 = vmatprep.subr.bf16.mxu1 %v835_v13  ;;  %v190_v13 = vld [vmem:[#allocation5 + $0x458] sm:$0xff]  ;;  %v43_v15 = vld [vmem:[#allocation2] sm:$0xff]  ;;  %v857_v17 = vpack.c.bf16 %v185_v10, %v181_v8  ;;  %v731_v18 = vpack.c.bf16 %v192_v12, %v188_v11  ;;  %v193_v23 = vld [vmem:[#allocation5 + $0x470] sm:$0xff] }
  0x56   :  { %v859_v22 = vpack.c.bf16 %v194_v14, %v190_v13  ;;  %v196_v24 = vld [vmem:[#allocation5 + $0x488] sm:$0xff]  ;;  %v198_v26 = vld [vmem:[#allocation5 + $0x498] sm:$0xff]  ;;  %v201_v35 = vld [vmem:[#allocation5 + $0x4b0] sm:$0xff] }
  0x57   :  { %710 = vmatpush1.bf16.msra.mxu0 %v709_v19  ;;  %v187_v19 = vld [vmem:[#allocation5 + $0x440] sm:$0xff]  ;;  %v202_v27 = vld [vmem:[#allocation5 + $0x4b8] sm:$0xff]  ;;  %v204_v36 = vld [vmem:[#allocation5 + $0x4c8] sm:$0xff] }
  0x58   :  { %838 = vmatpush1.bf16.msra.mxu1 %v837_v20  ;;  %712 = vmatprep.subr.bf16.mxu0 %v711_v21  ;;  %v191_v20 = vld [vmem:[#allocation5 + $0x460] sm:$0xff]  ;;  %v189_v21 = vld [vmem:[#allocation5 + $0x450] sm:$0xff]  ;;  %v863_v34 = vpack.c.bf16 %v202_v27, %v198_v26  ;;  %v206_v38 = vld [vmem:[#allocation5 + $0x4d8] sm:$0xff] }
  0x59   :  { %840 = vmatprep.subr.bf16.mxu1 %v839_v25  ;;  %v200_v25 = vld [vmem:[#allocation5 + $0x4a8] sm:$0xff]  ;;  %v733_v28 = vpack.c.bf16 %v191_v20, %v187_v19  ;;  %v861_v29 = vpack.c.bf16 %v193_v23, %v189_v21  ;;  %v210_v39 = vld [vmem:[#allocation5 + $0x4f8] sm:$0xff]  ;;  %v209_v47 = vld [vmem:[#allocation5 + $0x4f0] sm:$0xff] }
  0x5a   :  { %v735_v30 = vpack.c.bf16 %v200_v25, %v196_v24  ;;  %v867_v46 = vpack.c.bf16 %v210_v39, %v206_v38  ;;  %v212_v48 = vld [vmem:[#allocation5 + $0x508] sm:$0xff]  ;;  %v214_v50 = vld [vmem:[#allocation5 + $0x518] sm:$0xff]  ;;  %v217_v59 = vld [vmem:[#allocation5 + $0x530] sm:$0xff] }
  0x5b   :  { %714 = vmatpush1.bf16.msra.mxu0 %v713_v31  ;;  %v195_v31 = vld [vmem:[#allocation5 + $0x480] sm:$0xff]  ;;  %v218_v51 = vld [vmem:[#allocation5 + $0x538] sm:$0xff]  ;;  %v220_v60 = vld [vmem:[#allocation5 + $0x548] sm:$0xff] }
  0x5c   :  { %842 = vmatpush1.bf16.msra.mxu1 %v841_v32  ;;  %716 = vmatprep.subr.bf16.mxu0 %v715_v33  ;;  %v199_v32 = vld [vmem:[#allocation5 + $0x4a0] sm:$0xff]  ;;  %v197_v33 = vld [vmem:[#allocation5 + $0x490] sm:$0xff]  ;;  %v871_v58 = vpack.c.bf16 %v218_v51, %v214_v50  ;;  %v222_v62 = vld [vmem:[#allocation5 + $0x558] sm:$0xff] }
  0x5d   :  { %844 = vmatprep.subr.bf16.mxu1 %v843_v37  ;;  %v208_v37 = vld [vmem:[#allocation5 + $0x4e8] sm:$0xff]  ;;  %v737_v40 = vpack.c.bf16 %v199_v32, %v195_v31  ;;  %v865_v41 = vpack.c.bf16 %v201_v35, %v197_v33  ;;  %v226_v63 = vld [vmem:[#allocation5 + $0x578] sm:$0xff]  ;;  %v225_v7 = vld [vmem:[#allocation5 + $0x570] sm:$0xff] }
  0x5e   :  { %v739_v42 = vpack.c.bf16 %v208_v37, %v204_v36  ;;  %v875_v6 = vpack.c.bf16 %v226_v63, %v222_v62  ;;  %v228_v8 = vld [vmem:[#allocation5 + $0x588] sm:$0xff]  ;;  %v230_v10 = vld [vmem:[#allocation5 + $0x598] sm:$0xff]  ;;  %v227_v14 = vld [vmem:[#allocation5 + $0x580] sm:$0xff] }
  0x5f   :  { %718 = vmatpush1.bf16.msra.mxu0 %v717_v43  ;;  %v203_v43 = vld [vmem:[#allocation5 + $0x4c0] sm:$0xff]  ;;  %v234_v11 = vld [vmem:[#allocation5 + $0x5b8] sm:$0xff]  ;;  %v48_v12 = vld [vmem:[#allocation2 + $0x28] sm:$0xff] }
  0x60   :  { %846 = vmatpush1.bf16.msra.mxu1 %v845_v44  ;;  %720 = vmatprep.subr.bf16.mxu0 %v719_v45  ;;  %v207_v44 = vld [vmem:[#allocation5 + $0x4e0] sm:$0xff]  ;;  %v205_v45 = vld [vmem:[#allocation5 + $0x4d0] sm:$0xff]  ;;  %v879_v21 = vpack.c.bf16 %v234_v11, %v230_v10  ;;  %v240_v23 = vld [vmem:[#allocation5 + $0x5e8] sm:$0xff] }
  0x61   :  { %848 = vmatprep.subr.bf16.mxu1 %v847_v49  ;;  %v216_v49 = vld [vmem:[#allocation5 + $0x528] sm:$0xff]  ;;  %v741_v52 = vpack.c.bf16 %v207_v44, %v203_v43  ;;  %v869_v53 = vpack.c.bf16 %v209_v47, %v205_v45  ;;  %v229_v19 = vld [vmem:[#allocation5 + $0x590] sm:$0xff]  ;;  %v46_v24 = vld [vmem:[#allocation2 + $0x18] sm:$0xff] }
  0x62   :  { %v743_v54 = vpack.c.bf16 %v216_v49, %v212_v48  ;;  %v233_v20 = vld [vmem:[#allocation5 + $0x5b0] sm:$0xff]  ;;  %v238_v25 = vld [vmem:[#allocation5 + $0x5d8] sm:$0xff]  ;;  %v239_v31 = vld [vmem:[#allocation5 + $0x5e0] sm:$0xff] }
  0x63   :  { %722 = vmatpush1.bf16.msra.mxu0 %v721_v55  ;;  %v211_v55 = vld [vmem:[#allocation5 + $0x500] sm:$0xff]  ;;  %v242_v26 = vld [vmem:[#allocation5 + $0x5f8] sm:$0xff]  ;;  %v237_v32 = vld [vmem:[#allocation5 + $0x5d0] sm:$0xff] }
  0x64   :  { %850 = vmatpush1.bf16.msra.mxu1 %v849_v56  ;;  %724 = vmatprep.subr.bf16.mxu0 %v723_v57  ;;  %v215_v56 = vld [vmem:[#allocation5 + $0x520] sm:$0xff]  ;;  %v213_v57 = vld [vmem:[#allocation5 + $0x510] sm:$0xff]  ;;  %v883_v33 = vpack.c.bf16 %v242_v26, %v238_v25  ;;  %v244_v35 = vld [vmem:[#allocation5 + $0x608] sm:$0xff] }
  0x65   :  { %852 = vmatprep.subr.bf16.mxu1 %v851_v61  ;;  %v224_v61 = vld [vmem:[#allocation5 + $0x568] sm:$0xff]  ;;  %v745_v0 = vpack.c.bf16 %v215_v56, %v211_v55  ;;  %v873_v1 = vpack.c.bf16 %v217_v59, %v213_v57  ;;  %v246_v37 = vld [vmem:[#allocation5 + $0x618] sm:$0xff]  ;;  %v247_v43 = vld [vmem:[#allocation5 + $0x620] sm:$0xff] }
  0x66   :  { %v747_v2 = vpack.c.bf16 %v224_v61, %v220_v60  ;;  %v248_v36 = vld [vmem:[#allocation5 + $0x628] sm:$0xff]  ;;  %v250_v38 = vld [vmem:[#allocation5 + $0x638] sm:$0xff]  ;;  %v245_v44 = vld [vmem:[#allocation5 + $0x610] sm:$0xff] }
  0x67   :  { %726 = vmatpush1.bf16.msra.mxu0 %v725_v3  ;;  %v219_v3 = vld [vmem:[#allocation5 + $0x540] sm:$0xff]  ;;  %v887_v45 = vpack.c.bf16 %v250_v38, %v246_v37  ;;  %v252_v47 = vld [vmem:[#allocation5 + $0x648] sm:$0xff]  ;;  %v254_v49 = vld [vmem:[#allocation5 + $0x658] sm:$0xff] }
  0x68   :  { %854 = vmatpush1.bf16.msra.mxu1 %v853_v4  ;;  %728 = vmatprep.subr.bf16.mxu0 %v727_v5  ;;  %v223_v4 = vld [vmem:[#allocation5 + $0x560] sm:$0xff]  ;;  %v221_v5 = vld [vmem:[#allocation5 + $0x550] sm:$0xff]  ;;  %v256_v48 = vld [vmem:[#allocation5 + $0x668] sm:$0xff] }
  0x69   :  { %856 = vmatprep.subr.bf16.mxu1 %v855_v9  ;;  %v232_v9 = vld [vmem:[#allocation5 + $0x5a8] sm:$0xff]  ;;  %v749_v13 = vpack.c.bf16 %v223_v4, %v219_v3  ;;  %v258_v50 = vld [vmem:[#allocation5 + $0x678] sm:$0xff]  ;;  %v255_v55 = vld [vmem:[#allocation5 + $0x660] sm:$0xff] }
  0x6a   :  { %394 = vmatmul.mubr.f32.vlgmr.msra.gmra.mrb[0].mxu0 %v43_v15  ;;  %v253_v56 = vld [vmem:[#allocation5 + $0x650] sm:$0xff]  ;;  %v891_v57 = vpack.c.bf16 %v258_v50, %v254_v49  ;;  %v260_v59 = vld [vmem:[#allocation5 + $0x688] sm:$0xff]  ;;  %v262_v61 = vld [vmem:[#allocation5 + $0x698] sm:$0xff] }
  0x6b   :  { %730 = vmatpush1.bf16.msra.mxu0 %v729_v16  ;;  %548 = vmatmul.mubr.f32.vlgmr.msra.gmra.mrb[0].mxu1 %v43_v15  ;;  %v47_v15 = vld [vmem:[#allocation2 + $0x20] sm:$0xff]  ;;  %v877_v16 = vpack.c.bf16 %v225_v7, %v221_v5  ;;  %v264_v60 = vld [vmem:[#allocation5 + $0x6a8] sm:$0xff]  ;;  %v266_v62 = vld [vmem:[#allocation5 + $0x6b8] sm:$0xff] }
  0x6c   :  { %858 = vmatpush1.bf16.msra.mxu1 %v857_v17  ;;  %732 = vmatprep.subr.bf16.mxu0 %v731_v18  ;;  %v751_v17 = vpack.c.bf16 %v232_v9, %v228_v8  ;;  %v231_v18 = vld [vmem:[#allocation5 + $0x5a0] sm:$0xff]  ;;  %v261_v4 = vld [vmem:[#allocation5 + $0x690] sm:$0xff]  ;;  %v895_v5 = vpack.c.bf16 %v266_v62, %v262_v61  ;;  %v268_v7 = vld [vmem:[#allocation5 + $0x6c8] sm:$0xff] }
  0x6d   :  { %860 = vmatprep.subr.bf16.mxu1 %v859_v22  ;;  %399 = vmatprep.mubr.f32.mxu0 %v48_v12  ;;  %v236_v22 = vld [vmem:[#allocation5 + $0x5c8] sm:$0xff]  ;;  %v753_v27 = vpack.c.bf16 %v231_v18, %v227_v14  ;;  %v263_v3 = vld [vmem:[#allocation5 + $0x6a0] sm:$0xff]  ;;  %v270_v9 = vld [vmem:[#allocation5 + $0x6d8] sm:$0xff] }
  0x6e   :  { %553 = vmatprep.mubr.f32.mxu1 %v48_v12  ;;  %400 = vmatmul.mubr.f32.gmra.mrb[2].mxu0 %v47_v15  ;;  %v272_v8 = vld [vmem:[#allocation5 + $0x6e8] sm:$0xff]  ;;  %v274_v10 = vld [vmem:[#allocation5 + $0x6f8] sm:$0xff]  ;;  %v267_v14 = vld [vmem:[#allocation5 + $0x6c0] sm:$0xff] }
  0x6f   :  { %734 = vmatpush1.bf16.msra.mxu0 %v733_v28  ;;  %554 = vmatmul.mubr.f32.gmra.mrb[2].mxu1 %v47_v15  ;;  %v881_v28 = vpack.c.bf16 %v233_v20, %v229_v19  ;;  %v271_v15 = vld [vmem:[#allocation5 + $0x6e0] sm:$0xff]  ;;  %v273_v18 = vld [vmem:[#allocation5 + $0x6f0] sm:$0xff]  ;;  %v276_v19 = vld [vmem:[#allocation5 + $0x708] sm:$0xff] }
  0x70   :  { %862 = vmatpush1.bf16.msra.mxu1 %v861_v29  ;;  %736 = vmatprep.subr.bf16.mxu0 %v735_v30  ;;  %v755_v29 = vpack.c.bf16 %v240_v23, %v236_v22  ;;  %v235_v30 = vld [vmem:[#allocation5 + $0x5c0] sm:$0xff]  ;;  %v280_v20 = vld [vmem:[#allocation5 + $0x728] sm:$0xff]  ;;  %v282_v22 = vld [vmem:[#allocation5 + $0x738] sm:$0xff]  ;;  %v773_v23 = vpack.c.bf16 %v271_v15, %v267_v14 }
  0x71   :  { %864 = vmatprep.subr.bf16.mxu1 %v863_v34  ;;  %470 = vmatprep.mubr.f32.mxu0 %v46_v24  ;;  %v241_v34 = vld [vmem:[#allocation5 + $0x5f0] sm:$0xff]  ;;  %v757_v39 = vpack.c.bf16 %v239_v31, %v235_v30  ;;  %v775_v25 = vpack.c.bf16 %v280_v20, %v276_v19  ;;  %v275_v26 = vld [vmem:[#allocation5 + $0x700] sm:$0xff]  ;;  %v284_v31 = vld [vmem:[#allocation5 + $0x748] sm:$0xff] }
  0x72   :  { %624 = vmatprep.mubr.f32.mxu1 %v46_v24  ;;  %v281_v30 = vld [vmem:[#allocation5 + $0x730] sm:$0xff]  ;;  %v283_v38 = vld [vmem:[#allocation5 + $0x740] sm:$0xff] }
  0x73   :  { %738 = vmatpush1.bf16.msra.mxu0 %v737_v40  ;;  %v885_v40 = vpack.c.bf16 %v241_v34, %v237_v32  ;;  %v288_v32 = vld [vmem:[#allocation5 + $0x768] sm:$0xff]  ;;  %v290_v34 = vld [vmem:[#allocation5 + $0x778] sm:$0xff]  ;;  %v291_v50 = vld [vmem:[#allocation5 + $0x780] sm:$0xff] }
  0x74   :  { %866 = vmatpush1.bf16.msra.mxu1 %v865_v41  ;;  %740 = vmatprep.subr.bf16.mxu0 %v739_v42  ;;  %v759_v41 = vpack.c.bf16 %v248_v36, %v244_v35  ;;  %v243_v42 = vld [vmem:[#allocation5 + $0x600] sm:$0xff]  ;;  %v779_v37 = vpack.c.bf16 %v288_v32, %v284_v31 }
  0x75   :  { %868 = vmatprep.subr.bf16.mxu1 %v867_v46  ;;  %v249_v46 = vld [vmem:[#allocation5 + $0x630] sm:$0xff]  ;;  %v761_v51 = vpack.c.bf16 %v247_v43, %v243_v42  ;;  %v292_v43 = vld [vmem:[#allocation5 + $0x788] sm:$0xff]  ;;  %v299_v62 = vld [vmem:[#allocation5 + $0x7c0] sm:$0xff] }
  0x76   :  { %v289_v42 = vld [vmem:[#allocation5 + $0x770] sm:$0xff] }
  0x77   :  { %742 = vmatpush1.bf16.msra.mxu0 %v741_v52  ;;  %v889_v52 = vpack.c.bf16 %v249_v46, %v245_v44  ;;  %v296_v44 = vld [vmem:[#allocation5 + $0x7a8] sm:$0xff]  ;;  %v298_v46 = vld [vmem:[#allocation5 + $0x7b8] sm:$0xff] }
  0x78   :  { %870 = vmatpush1.bf16.msra.mxu1 %v869_v53  ;;  %744 = vmatprep.subr.bf16.mxu0 %v743_v54  ;;  %v763_v53 = vpack.c.bf16 %v256_v48, %v252_v47  ;;  %v251_v54 = vld [vmem:[#allocation5 + $0x640] sm:$0xff]  ;;  %v783_v49 = vpack.c.bf16 %v296_v44, %v292_v43 }
  0x79   :  { %872 = vmatprep.subr.bf16.mxu1 %v871_v58  ;;  %v257_v58 = vld [vmem:[#allocation5 + $0x670] sm:$0xff]  ;;  %v765_v63 = vpack.c.bf16 %v255_v55, %v251_v54  ;;  %v300_v55 = vld [vmem:[#allocation5 + $0x7c8] sm:$0xff] }
  0x7a   :  { %v297_v54 = vld [vmem:[#allocation5 + $0x7b0] sm:$0xff] }
  0x7b   :  { %746 = vmatpush1.bf16.msra.mxu0 %v745_v0  ;;  %v893_v0 = vpack.c.bf16 %v257_v58, %v253_v56  ;;  %v304_v56 = vld [vmem:[#allocation5 + $0x7e8] sm:$0xff]  ;;  %v306_v58 = vld [vmem:[#allocation5 + $0x7f8] sm:$0xff] }
  0x7c   :  { %874 = vmatpush1.bf16.msra.mxu1 %v873_v1  ;;  %748 = vmatprep.subr.bf16.mxu0 %v747_v2  ;;  %v767_v1 = vpack.c.bf16 %v264_v60, %v260_v59  ;;  %v259_v2 = vld [vmem:[#allocation5 + $0x680] sm:$0xff]  ;;  %v787_v61 = vpack.c.bf16 %v304_v56, %v300_v55 }
  0x7d   :  { %876 = vmatprep.subr.bf16.mxu1 %v875_v6  ;;  %v265_v6 = vld [vmem:[#allocation5 + $0x6b0] sm:$0xff]  ;;  %v769_v11 = vpack.c.bf16 %v263_v3, %v259_v2 }
  0x7e   :  { %v897_v12 = vpack.c.bf16 %v265_v6, %v261_v4  ;;  %v305_v2 = vld [vmem:[#allocation5 + $0x7f0] sm:$0xff]  ;;  %v50_v6 = vld [vmem:[#allocation2 + $0x38] sm:$0xff] }
  0x7f   :  { %750 = vmatpush1.bf16.msra.mxu0 %v749_v13  ;;  %v771_v13 = vpack.c.bf16 %v272_v8, %v268_v7  ;;  %v49_v7 = vld [vmem:[#allocation2 + $0x30] sm:$0xff]  ;;  %v309_v8 = vlaneseq }
  0x80   :  { %878 = vmatpush1.bf16.msra.mxu1 %v877_v16  ;;  %752 = vmatprep.subr.bf16.mxu0 %v751_v17  ;;  %v269_v16 = vld [vmem:[#allocation5 + $0x6d0] sm:$0xff]  ;;  %v899_v17 = vpack.c.bf16 %v274_v10, %v270_v9 }
  0x81   :  { %880 = vmatprep.subr.bf16.mxu1 %v879_v21  ;;  %v278_v21 = vld [vmem:[#allocation5 + $0x718] sm:$0xff]  ;;  %v901_v24 = vpack.c.bf16 %v273_v18, %v269_v16  ;;  %v310_v9 = vshrl.u32 %v309_v8, 7 }
  0x83   :  { %754 = vmatpush1.bf16.msra.mxu0 %v753_v27  ;;  %v279_v27 = vld [vmem:[#allocation5 + $0x720] sm:$0xff]  ;;  %v311_v10 = vsub.s32 0, %v310_v9  ;;  %v323_v14 = vsub.s32 3, %v310_v9 }
  0x84   :  { %882 = vmatpush1.bf16.msra.mxu1 %v881_v28  ;;  %756 = vmatprep.subr.bf16.mxu0 %v755_v29  ;;  %v277_v28 = vld [vmem:[#allocation5 + $0x710] sm:$0xff]  ;;  %v903_v29 = vpack.c.bf16 %v282_v22, %v278_v21  ;;  %v777_v35 = vpack.c.bf16 %v279_v27, %v275_v26 }
  0x85   :  { %884 = vmatprep.subr.bf16.mxu1 %v883_v33  ;;  %v286_v33 = vld [vmem:[#allocation5 + $0x758] sm:$0xff]  ;;  %v905_v36 = vpack.c.bf16 %v281_v30, %v277_v28 }
  0x87   :  { %758 = vmatpush1.bf16.msra.mxu0 %v757_v39  ;;  %v287_v39 = vld [vmem:[#allocation5 + $0x760] sm:$0xff] }
  0x88   :  { %886 = vmatpush1.bf16.msra.mxu1 %v885_v40  ;;  %760 = vmatprep.subr.bf16.mxu0 %v759_v41  ;;  %v285_v40 = vld [vmem:[#allocation5 + $0x750] sm:$0xff]  ;;  %v907_v41 = vpack.c.bf16 %v290_v34, %v286_v33  ;;  %v781_v47 = vpack.c.bf16 %v287_v39, %v283_v38 }
  0x89   :  { %888 = vmatprep.subr.bf16.mxu1 %v887_v45  ;;  %v294_v45 = vld [vmem:[#allocation5 + $0x798] sm:$0xff]  ;;  %v909_v48 = vpack.c.bf16 %v289_v42, %v285_v40 }
  0x8b   :  { %762 = vmatpush1.bf16.msra.mxu0 %v761_v51  ;;  %v295_v51 = vld [vmem:[#allocation5 + $0x7a0] sm:$0xff] }
  0x8c   :  { %890 = vmatpush1.bf16.msra.mxu1 %v889_v52  ;;  %764 = vmatprep.subr.bf16.mxu0 %v763_v53  ;;  %v293_v52 = vld [vmem:[#allocation5 + $0x790] sm:$0xff]  ;;  %v911_v53 = vpack.c.bf16 %v298_v46, %v294_v45  ;;  %v785_v59 = vpack.c.bf16 %v295_v51, %v291_v50 }
  0x8d   :  { %892 = vmatprep.subr.bf16.mxu1 %v891_v57  ;;  %v302_v57 = vld [vmem:[#allocation5 + $0x7d8] sm:$0xff]  ;;  %v913_v60 = vpack.c.bf16 %v297_v54, %v293_v52 }
  0x8f   :  { %766 = vmatpush1.bf16.msra.mxu0 %v765_v63  ;;  %v303_v63 = vld [vmem:[#allocation5 + $0x7e0] sm:$0xff] }
  0x90   :  { %894 = vmatpush1.bf16.msra.mxu1 %v893_v0  ;;  %768 = vmatprep.subr.bf16.mxu0 %v767_v1  ;;  %v915_v0 = vpack.c.bf16 %v306_v58, %v302_v57  ;;  %v301_v1 = vld [vmem:[#allocation5 + $0x7d0] sm:$0xff]  ;;  %v789_v3 = vpack.c.bf16 %v303_v63, %v299_v62 }
  0x91   :  { %896 = vmatprep.subr.bf16.mxu1 %v895_v5  ;;  %v917_v4 = vpack.c.bf16 %v305_v2, %v301_v1  ;;  %v45_v5 = vld [vmem:[#allocation2 + $0x10] sm:$0xff] }
  0x93   :  { %770 = vmatpush1.bf16.msra.mxu0 %v769_v11  ;;  %v307_v11 = vld [vmem:[%s1087_s2] sm:$0xf]  ;;  %s1016_s2 = smov [#allocation7]  }
  0x94   :  { %898 = vmatpush1.bf16.msra.mxu1 %v897_v12  ;;  %772 = vmatprep.subr.bf16.mxu0 %v771_v13  ;;  %v319_v12 = vsub.s32 2, %v310_v9  ;;  %v315_v13 = vsub.s32 1, %v310_v9  ;;  %v312_v15 = vrot.slane %v307_v11, %v311_v10  ;;  %v324_v18 = vrot.slane %v307_v11, %v323_v14  ;;  %s650_s11 = sshll.u32 %s1016_s2, 4  ;;  %s651_s11 = int_to_ptr.vmem [resolvable:$true] %s650_s11 }
  0x95   :  { %900 = vmatprep.subr.bf16.mxu1 %v899_v17  ;;  %s984_s12 = scalar_lea.vmem %s651_s11, 1024  ;;  %p989_p3 = scmp.lt.s32.totalorder %s651_s11, %s651_s11 }
  0x96   :  { %v320_v16 = vrot.slane %v307_v11, %v319_v12  ;;  %v316_v17 = vrot.slane %v307_v11, %v315_v13  ;;  %p985_p2 = scmp.ne.s32.totalorder %s651_s11, %s984_s12  ;;  %p990_p4 = scmp.lt.s32.totalorder %s984_s12, %s984_s12 }
  0x97   :  { %774 = vmatpush1.bf16.msra.mxu0 %v773_v23 }
  0x98   :  { %902 = vmatpush1.bf16.msra.mxu1 %v901_v24  ;;  %776 = vmatprep.subr.bf16.mxu0 %v775_v25  ;;  %p991_p5 = por %p990_p4, %p989_p3 }
  0x99   :  { %904 = vmatprep.subr.bf16.mxu1 %v903_v29 }
  0x9a   :  { %p992_p6 = pnand %p991_p5, %p985_p2 }
  0x9b   :  { %778 = vmatpush1.bf16.msra.mxu0 %v777_v35 }
  0x9c   :  { %906 = vmatpush1.bf16.msra.mxu1 %v905_v36  ;;  %780 = vmatprep.subr.bf16.mxu0 %v779_v37 }
  0x9d   :  { %908 = vmatprep.subr.bf16.mxu1 %v907_v41 }
  0x9f   :  { %782 = vmatpush1.bf16.msra.mxu0 %v781_v47 }
  0xa0   :  { %910 = vmatpush1.bf16.msra.mxu1 %v909_v48  ;;  %784 = vmatprep.subr.bf16.mxu0 %v783_v49 }
  0xa1   :  { %912 = vmatprep.subr.bf16.mxu1 %v911_v53 }
  0xa3   :  { %786 = vmatpush1.bf16.msra.mxu0 %v785_v59 }
  0xa4   :  { %914 = vmatpush1.bf16.msra.mxu1 %v913_v60  ;;  %788 = vmatprep.subr.bf16.mxu0 %v787_v61 }
  0xa5   :  { %916 = vmatprep.subr.bf16.mxu1 %v915_v0 }
  0xa7   :  { %790 = vmatpush1.bf16.msra.mxu0 %v789_v3 }
  0xa8   :  { %918 = vmatpush1.bf16.msra.mxu1 %v917_v4 }
  0xaa   :  { %471 = vmatmul.mubr.f32.vlgmr.msra.gmra.mrb[0].mxu0 %v45_v5 }
  0xab   :  { %625 = vmatmul.mubr.f32.vlgmr.msra.gmra.mrb[0].mxu1 %v45_v5  ;;  %476 = vmatprep.mubr.f32.mxu0 %v50_v6 }
  0xac   :  { %630 = vmatprep.mubr.f32.mxu1 %v50_v6 }
  0xae   :  { %477 = vmatmul.mubr.f32.gmra.mrb[2].mxu0 %v49_v7 }
  0xaf   :  { %631 = vmatmul.mubr.f32.gmra.mrb[2].mxu1 %v49_v7 }
 0x17d   :  { %v472_v19 = vpop.f32.mrb[0].mxu0 }
 0x17e   :  { %v919_v20 = vadd.f32 %v472_v19, %v312_v15  ;;  %v626_v21 = vpop.f32.mrb[0].mxu1  ;;  %v474_v22 = vpop.f32.mrb[1].mxu0 }
 0x17f   :  { %v923_v23 = vadd.f32 %v626_v21, %v320_v16  ;;  %v920_v24 = vadd.f32 %v474_v22, %v316_v17  ;;  %v628_v25 = vpop.f32.mrb[1].mxu1 }
 0x180   :  { %637 = vst [vmem:[#allocation7] sm:$0xff] %v919_v20  ;;  %v924_v26 = vadd.f32 %v628_v25, %v324_v18 }
 0x181   :  { %639 = vst [vmem:[#allocation7 + $0x10] sm:$0xff] %v923_v23  ;;  %638 = vst [vmem:[#allocation7 + $0x8] sm:$0xff] %v920_v24  ;;  %v478_v27 = vpop.f32.mrb[2].mxu0 }
 0x182   :  { %640 = vst [vmem:[#allocation7 + $0x18] sm:$0xff] %v924_v26  ;;  %v921_v28 = vadd.f32 %v478_v27, %v312_v15  ;;  %v632_v29 = vpop.f32.mrb[2].mxu1  ;;  %v480_v30 = vpop.f32.mrb[3].mxu0 }
 0x183   :  { %v925_v31 = vadd.f32 %v632_v29, %v320_v16  ;;  %v922_v32 = vadd.f32 %v480_v30, %v316_v17  ;;  %v634_v33 = vpop.f32.mrb[3].mxu1 }
 0x184   :  { %641 = vst [vmem:[#allocation7 + $0x20] sm:$0xff] %v921_v28  ;;  %v926_v34 = vadd.f32 %v634_v33, %v324_v18 }
 0x185   :  { %643 = vst [vmem:[#allocation7 + $0x30] sm:$0xff] %v925_v31  ;;  %642 = vst [vmem:[#allocation7 + $0x28] sm:$0xff] %v922_v32 }
 0x186   :  { %644 = vst [vmem:[#allocation7 + $0x38] sm:$0xff] %v926_v34 }
 0x187   :  { %995 = shalt.err (!%p992_p6)
}
 0x188   :  { %s996_s15 = scalar_lea.hbm %s1088_s3, 1024 }
 0x189   :  { %p997_p7 = scmp.ne.s32.totalorder %s1088_s3, %s996_s15  ;;  %p1000_p8 = scmp.lt.u32.totalorder %s996_s15, %s1088_s3 }
 0x18b   :  { %p1002_p9 = pnand %p1000_p8, %p997_p7 }
 0x18d   :  { %1005 = shalt.err (!%p1002_p9)
}
 0x18e   :  { %656 = dma.vmem_to_hbm [thread:$0]  %s651_s11, 1024, %s1088_s3, [#allocation4], %s1013_s22, %s1013_s22, %s1014_s23  }
 0x18f   :  { %1010 = dma.done.wait [#allocation4], 1024  }
 0x190   :  { %1011 = vsyncadd [#allocation4], 4294966272 }
 0x191   :  { %660 = vsyncpa [#allocation3], 1 }
 0x192   :  { %661 = vsyncpa [#allocation6], 1 }
 0x193   :  { %662 = vsyncpa [#allocation4], 1 }

// kernel: tpu_custom_call.1
= control target key start
LH: loop header
LB: loop body
LE: loop exit
PB: predicated region body
PF: predicated region fallthrough
CT: control target
= control target key end

     0   :  { %8 = vsyncpa [#allocation3], 0  ;;  %s1085_s0 = inlined_call_operand.hbm [shape: f32[16,512], index: 0, kind: input, shape index: {}]   ;;  %s1086_s1 = inlined_call_operand.hbm [shape: f32[512,512], index: 1, kind: input, shape index: {}]   ;;  %s1087_s2 = inlined_call_operand.vmem [shape: f32[1,512], index: 2, kind: input, shape index: {}]   ;;  %s1088_s3 = inlined_call_operand.hbm [shape: f32[16,512], index: 3, kind: output, shape index: {}]  }
   0x1   :  { %9 = vsyncpa [#allocation6], 0 }
   0x2   :  { %10 = vsyncpa [#allocation4], 0  ;;  %s1012_s12 = smov [#allocation2]   ;;  %s940_s16 = scalar_lea.hbm %s1085_s0, 1024 }
   0x3   :  { %s16_s13 = sshll.u32 %s1012_s12, 4  ;;  %p941_p0 = scmp.ne.s32.totalorder %s1085_s0, %s940_s16  ;;  %s17_s13 = int_to_ptr.vmem [resolvable:$true] %s16_s13 }
   0x4   :  { %p944_p1 = scmp.lt.u32.totalorder %s940_s16, %s1085_s0 }
   0x6   :  { %p946_p2 = pnand %p944_p1, %p941_p0 }
   0x8   :  { %949 = shalt.err (!%p946_p2)
}
   0x9   :  { %s950_s21 = scalar_lea.vmem %s17_s13, 1024  ;;  %p955_p4 = scmp.lt.s32.totalorder %s17_s13, %s17_s13 }
   0xa   :  { %p951_p3 = scmp.ne.s32.totalorder %s17_s13, %s950_s21  ;;  %p956_p5 = scmp.lt.s32.totalorder %s950_s21, %s950_s21 }
   0xc   :  { %p957_p6 = por %p956_p5, %p955_p4 }
   0xe   :  { %p958_p7 = pnand %p957_p6, %p951_p3 }
  0x10   :  { %961 = shalt.err (!%p958_p7)
}
  0x11   :  { %s1013_s22 = smov 512   ;;  %s1014_s23 = smov 32  }
  0x12   :  { %22 = dma.hbm_to_vmem [thread:$0]  %s1085_s0, 1024, %s17_s13, [#allocation3], %s1013_s22, %s1013_s22, %s1014_s23  }
  0x13   :  { %s1015_s26 = smov [#allocation5]   ;;  %s962_s30 = scalar_lea.hbm %s1086_s1, 32768 }
  0x14   :  { %s28_s27 = sshll.u32 %s1015_s26, 4  ;;  %p963_p8 = scmp.ne.s32.totalorder %s1086_s1, %s962_s30  ;;  %s29_s27 = int_to_ptr.vmem [resolvable:$true] %s28_s27 }
  0x15   :  { %p966_p9 = scmp.lt.u32.totalorder %s962_s30, %s1086_s1 }
  0x17   :  { %p968_p10 = pnand %p966_p9, %p963_p8 }
  0x19   :  { %971 = shalt.err (!%p968_p10)
}
  0x1a   :  { %s972_s8 = scalar_lea.vmem %s29_s27, 32768  ;;  %p977_p12 = scmp.lt.s32.totalorder %s29_s27, %s29_s27 }
  0x1b   :  { %p973_p11 = scmp.ne.s32.totalorder %s29_s27, %s972_s8  ;;  %p978_p13 = scmp.lt.s32.totalorder %s972_s8, %s972_s8 }
  0x1d   :  { %p979_p0 = por %p978_p13, %p977_p12 }
  0x1f   :  { %p980_p1 = pnand %p979_p0, %p973_p11 }
  0x21   :  { %983 = shalt.err (!%p980_p1)
}
  0x22   :  { %34 = dma.hbm_to_vmem [thread:$0]  %s1086_s1, 32768, %s29_s27, [#allocation6], %s1013_s22, %s1013_s22, %s1014_s23  }
  0x23   :  { %1006 = dma.done.wait [#allocation3], 1024  }
  0x24   :  { %1007 = vsyncadd [#allocation3], 4294966272 }
  0x25   :  { %1008 = dma.done.wait [#allocation6], 32768  }
  0x26   :  { %1009 = vsyncadd [#allocation6], 4294934528  ;;  %v52_v0 = vld [vmem:[#allocation5 + $0x8] sm:$0xff]  ;;  %v54_v2 = vld [vmem:[#allocation5 + $0x18] sm:$0xff] }
  0x27   :  { %v56_v1 = vld [vmem:[#allocation5 + $0x28] sm:$0xff]  ;;  %v58_v4 = vld [vmem:[#allocation5 + $0x38] sm:$0xff]  ;;  %v51_v5 = vld [vmem:[#allocation5] sm:$0xff] }
  0x28   :  { %v663_v3 = vpack.c.bf16 %v56_v1, %v52_v0  ;;  %v55_v6 = vld [vmem:[#allocation5 + $0x20] sm:$0xff]  ;;  %v791_v7 = vpack.c.bf16 %v58_v4, %v54_v2  ;;  %v53_v9 = vld [vmem:[#allocation5 + $0x10] sm:$0xff]  ;;  %v60_v11 = vld [vmem:[#allocation5 + $0x48] sm:$0xff] }
  0x29   :  { %v665_v8 = vpack.c.bf16 %v55_v6, %v51_v5  ;;  %v57_v10 = vld [vmem:[#allocation5 + $0x30] sm:$0xff]  ;;  %v64_v13 = vld [vmem:[#allocation5 + $0x68] sm:$0xff]  ;;  %v62_v14 = vld [vmem:[#allocation5 + $0x58] sm:$0xff] }
  0x2a   :  { %664 = vmatprep.subr.bf16.mxu0 %v663_v3  ;;  %v793_v12 = vpack.c.bf16 %v57_v10, %v53_v9  ;;  %v66_v15 = vld [vmem:[#allocation5 + $0x78] sm:$0xff]  ;;  %792 = vmatprep.subr.bf16.mxu1 %v791_v7  ;;  %v667_v16 = vpack.c.bf16 %v64_v13, %v60_v11  ;;  %v59_v18 = vld [vmem:[#allocation5 + $0x40] sm:$0xff]  ;;  %v61_v20 = vld [vmem:[#allocation5 + $0x50] sm:$0xff] }
  0x2b   :  { %666 = vmatpush1.bf16.msra.mxu0 %v665_v8  ;;  %v795_v17 = vpack.c.bf16 %v66_v15, %v62_v14  ;;  %v63_v19 = vld [vmem:[#allocation5 + $0x60] sm:$0xff]  ;;  %v65_v22 = vld [vmem:[#allocation5 + $0x70] sm:$0xff]  ;;  %v68_v23 = vld [vmem:[#allocation5 + $0x88] sm:$0xff] }
  0x2c   :  { %794 = vmatpush1.bf16.msra.mxu1 %v793_v12  ;;  %v669_v21 = vpack.c.bf16 %v63_v19, %v59_v18  ;;  %v72_v24 = vld [vmem:[#allocation5 + $0xa8] sm:$0xff]  ;;  %668 = vmatprep.subr.bf16.mxu0 %v667_v16  ;;  %v797_v25 = vpack.c.bf16 %v65_v22, %v61_v20  ;;  %v70_v27 = vld [vmem:[#allocation5 + $0x98] sm:$0xff]  ;;  %v67_v29 = vld [vmem:[#allocation5 + $0x80] sm:$0xff] }
  0x2d   :  { %796 = vmatprep.subr.bf16.mxu1 %v795_v17  ;;  %v671_v26 = vpack.c.bf16 %v72_v24, %v68_v23  ;;  %v74_v28 = vld [vmem:[#allocation5 + $0xb8] sm:$0xff]  ;;  %v71_v31 = vld [vmem:[#allocation5 + $0xa0] sm:$0xff]  ;;  %v69_v32 = vld [vmem:[#allocation5 + $0x90] sm:$0xff] }
  0x2e   :  { %v799_v30 = vpack.c.bf16 %v74_v28, %v70_v27  ;;  %v73_v33 = vld [vmem:[#allocation5 + $0xb0] sm:$0xff]  ;;  %v673_v34 = vpack.c.bf16 %v71_v31, %v67_v29  ;;  %v76_v35 = vld [vmem:[#allocation5 + $0xc8] sm:$0xff]  ;;  %v78_v37 = vld [vmem:[#allocation5 + $0xd8] sm:$0xff] }
  0x2f   :  { %670 = vmatpush1.bf16.msra.mxu0 %v669_v21  ;;  %v80_v36 = vld [vmem:[#allocation5 + $0xe8] sm:$0xff]  ;;  %v801_v38 = vpack.c.bf16 %v73_v33, %v69_v32  ;;  %v82_v40 = vld [vmem:[#allocation5 + $0xf8] sm:$0xff]  ;;  %v75_v41 = vld [vmem:[#allocation5 + $0xc0] sm:$0xff] }
  0x30   :  { %798 = vmatpush1.bf16.msra.mxu1 %v797_v25  ;;  %672 = vmatprep.subr.bf16.mxu0 %v671_v26  ;;  %v675_v39 = vpack.c.bf16 %v80_v36, %v76_v35  ;;  %v79_v42 = vld [vmem:[#allocation5 + $0xe0] sm:$0xff]  ;;  %v803_v43 = vpack.c.bf16 %v82_v40, %v78_v37  ;;  %v77_v44 = vld [vmem:[#allocation5 + $0xd0] sm:$0xff]  ;;  %v84_v46 = vld [vmem:[#allocation5 + $0x108] sm:$0xff] }
  0x31   :  { %800 = vmatprep.subr.bf16.mxu1 %v799_v30  ;;  %v81_v45 = vld [vmem:[#allocation5 + $0xf0] sm:$0xff]  ;;  %v88_v47 = vld [vmem:[#allocation5 + $0x128] sm:$0xff]  ;;  %v86_v48 = vld [vmem:[#allocation5 + $0x118] sm:$0xff]  ;;  %v677_v50 = vpack.c.bf16 %v79_v42, %v75_v41 }
  0x32   :  { %v90_v49 = vld [vmem:[#allocation5 + $0x138] sm:$0xff]  ;;  %v805_v51 = vpack.c.bf16 %v81_v45, %v77_v44  ;;  %v679_v52 = vpack.c.bf16 %v88_v47, %v84_v46  ;;  %v83_v53 = vld [vmem:[#allocation5 + $0x100] sm:$0xff]  ;;  %v85_v55 = vld [vmem:[#allocation5 + $0x110] sm:$0xff] }
  0x33   :  { %674 = vmatpush1.bf16.msra.mxu0 %v673_v34  ;;  %v87_v54 = vld [vmem:[#allocation5 + $0x120] sm:$0xff]  ;;  %v807_v56 = vpack.c.bf16 %v90_v49, %v86_v48  ;;  %v89_v57 = vld [vmem:[#allocation5 + $0x130] sm:$0xff]  ;;  %v92_v58 = vld [vmem:[#allocation5 + $0x148] sm:$0xff] }
  0x34   :  { %802 = vmatpush1.bf16.msra.mxu1 %v801_v38  ;;  %676 = vmatprep.subr.bf16.mxu0 %v675_v39  ;;  %v96_v59 = vld [vmem:[#allocation5 + $0x168] sm:$0xff]  ;;  %v94_v60 = vld [vmem:[#allocation5 + $0x158] sm:$0xff]  ;;  %v681_v62 = vpack.c.bf16 %v87_v54, %v83_v53  ;;  %v809_v63 = vpack.c.bf16 %v89_v57, %v85_v55  ;;  %v91_v1 = vld [vmem:[#allocation5 + $0x140] sm:$0xff] }
  0x35   :  { %804 = vmatprep.subr.bf16.mxu1 %v803_v43  ;;  %v98_v61 = vld [vmem:[#allocation5 + $0x178] sm:$0xff]  ;;  %v683_v0 = vpack.c.bf16 %v96_v59, %v92_v58  ;;  %v95_v2 = vld [vmem:[#allocation5 + $0x160] sm:$0xff]  ;;  %v93_v3 = vld [vmem:[#allocation5 + $0x150] sm:$0xff] }
  0x36   :  { %v811_v4 = vpack.c.bf16 %v98_v61, %v94_v60  ;;  %v97_v5 = vld [vmem:[#allocation5 + $0x170] sm:$0xff]  ;;  %v100_v6 = vld [vmem:[#allocation5 + $0x188] sm:$0xff]  ;;  %v102_v8 = vld [vmem:[#allocation5 + $0x198] sm:$0xff]  ;;  %v685_v10 = vpack.c.bf16 %v95_v2, %v91_v1 }
  0x37   :  { %678 = vmatpush1.bf16.msra.mxu0 %v677_v50  ;;  %v104_v7 = vld [vmem:[#allocation5 + $0x1a8] sm:$0xff]  ;;  %v106_v9 = vld [vmem:[#allocation5 + $0x1b8] sm:$0xff]  ;;  %v813_v11 = vpack.c.bf16 %v97_v5, %v93_v3  ;;  %v99_v13 = vld [vmem:[#allocation5 + $0x180] sm:$0xff] }
  0x38   :  { %806 = vmatpush1.bf16.msra.mxu1 %v805_v51  ;;  %680 = vmatprep.subr.bf16.mxu0 %v679_v52  ;;  %v687_v12 = vpack.c.bf16 %v104_v7, %v100_v6  ;;  %v103_v14 = vld [vmem:[#allocation5 + $0x1a0] sm:$0xff]  ;;  %v101_v15 = vld [vmem:[#allocation5 + $0x190] sm:$0xff]  ;;  %v815_v16 = vpack.c.bf16 %v106_v9, %v102_v8  ;;  %v108_v18 = vld [vmem:[#allocation5 + $0x1c8] sm:$0xff] }
  0x39   :  { %808 = vmatprep.subr.bf16.mxu1 %v807_v56  ;;  %v105_v17 = vld [vmem:[#allocation5 + $0x1b0] sm:$0xff]  ;;  %v112_v19 = vld [vmem:[#allocation5 + $0x1e8] sm:$0xff]  ;;  %v110_v20 = vld [vmem:[#allocation5 + $0x1d8] sm:$0xff]  ;;  %v689_v22 = vpack.c.bf16 %v103_v14, %v99_v13 }
  0x3a   :  { %v114_v21 = vld [vmem:[#allocation5 + $0x1f8] sm:$0xff]  ;;  %v817_v23 = vpack.c.bf16 %v105_v17, %v101_v15  ;;  %v691_v24 = vpack.c.bf16 %v112_v19, %v108_v18  ;;  %v107_v25 = vld [vmem:[#allocation5 + $0x1c0] sm:$0xff]  ;;  %v109_v27 = vld [vmem:[#allocation5 + $0x1d0] sm:$0xff] }
  0x3b   :  { %682 = vmatpush1.bf16.msra.mxu0 %v681_v62  ;;  %v111_v26 = vld [vmem:[#allocation5 + $0x1e0] sm:$0xff]  ;;  %v819_v28 = vpack.c.bf16 %v114_v21, %v110_v20  ;;  %v113_v29 = vld [vmem:[#allocation5 + $0x1f0] sm:$0xff]  ;;  %v116_v30 = vld [vmem:[#allocation5 + $0x208] sm:$0xff] }
  0x3c   :  { %810 = vmatpush1.bf16.msra.mxu1 %v809_v63  ;;  %684 = vmatprep.subr.bf16.mxu0 %v683_v0  ;;  %v120_v31 = vld [vmem:[#allocation5 + $0x228] sm:$0xff]  ;;  %v118_v32 = vld [vmem:[#allocation5 + $0x218] sm:$0xff]  ;;  %v693_v34 = vpack.c.bf16 %v111_v26, %v107_v25  ;;  %v821_v35 = vpack.c.bf16 %v113_v29, %v109_v27  ;;  %v115_v37 = vld [vmem:[#allocation5 + $0x200] sm:$0xff] }
  0x3d   :  { %812 = vmatprep.subr.bf16.mxu1 %v811_v4  ;;  %v122_v33 = vld [vmem:[#allocation5 + $0x238] sm:$0xff]  ;;  %v695_v36 = vpack.c.bf16 %v120_v31, %v116_v30  ;;  %v119_v38 = vld [vmem:[#allocation5 + $0x220] sm:$0xff]  ;;  %v117_v39 = vld [vmem:[#allocation5 + $0x210] sm:$0xff] }
  0x3e   :  { %v823_v40 = vpack.c.bf16 %v122_v33, %v118_v32  ;;  %v121_v41 = vld [vmem:[#allocation5 + $0x230] sm:$0xff]  ;;  %v124_v42 = vld [vmem:[#allocation5 + $0x248] sm:$0xff]  ;;  %v126_v44 = vld [vmem:[#allocation5 + $0x258] sm:$0xff]  ;;  %v697_v46 = vpack.c.bf16 %v119_v38, %v115_v37 }
  0x3f   :  { %686 = vmatpush1.bf16.msra.mxu0 %v685_v10  ;;  %v128_v43 = vld [vmem:[#allocation5 + $0x268] sm:$0xff]  ;;  %v130_v45 = vld [vmem:[#allocation5 + $0x278] sm:$0xff]  ;;  %v825_v47 = vpack.c.bf16 %v121_v41, %v117_v39  ;;  %v123_v49 = vld [vmem:[#allocation5 + $0x240] sm:$0xff] }
  0x40   :  { %814 = vmatpush1.bf16.msra.mxu1 %v813_v11  ;;  %688 = vmatprep.subr.bf16.mxu0 %v687_v12  ;;  %v699_v48 = vpack.c.bf16 %v128_v43, %v124_v42  ;;  %v127_v50 = vld [vmem:[#allocation5 + $0x260] sm:$0xff]  ;;  %v125_v51 = vld [vmem:[#allocation5 + $0x250] sm:$0xff]  ;;  %v827_v52 = vpack.c.bf16 %v130_v45, %v126_v44  ;;  %v132_v54 = vld [vmem:[#allocation5 + $0x288] sm:$0xff] }
  0x41   :  { %816 = vmatprep.subr.bf16.mxu1 %v815_v16  ;;  %v129_v53 = vld [vmem:[#allocation5 + $0x270] sm:$0xff]  ;;  %v136_v55 = vld [vmem:[#allocation5 + $0x2a8] sm:$0xff]  ;;  %v134_v56 = vld [vmem:[#allocation5 + $0x298] sm:$0xff]  ;;  %v701_v58 = vpack.c.bf16 %v127_v50, %v123_v49 }
  0x42   :  { %v138_v57 = vld [vmem:[#allocation5 + $0x2b8] sm:$0xff]  ;;  %v829_v59 = vpack.c.bf16 %v129_v53, %v125_v51  ;;  %v703_v60 = vpack.c.bf16 %v136_v55, %v132_v54  ;;  %v131_v61 = vld [vmem:[#allocation5 + $0x280] sm:$0xff]  ;;  %v133_v63 = vld [vmem:[#allocation5 + $0x290] sm:$0xff] }
  0x43   :  { %690 = vmatpush1.bf16.msra.mxu0 %v689_v22  ;;  %v135_v62 = vld [vmem:[#allocation5 + $0x2a0] sm:$0xff]  ;;  %v831_v0 = vpack.c.bf16 %v138_v57, %v134_v56  ;;  %v137_v1 = vld [vmem:[#allocation5 + $0x2b0] sm:$0xff]  ;;  %v140_v2 = vld [vmem:[#allocation5 + $0x2c8] sm:$0xff] }
  0x44   :  { %818 = vmatpush1.bf16.msra.mxu1 %v817_v23  ;;  %692 = vmatprep.subr.bf16.mxu0 %v691_v24  ;;  %v144_v3 = vld [vmem:[#allocation5 + $0x2e8] sm:$0xff]  ;;  %v142_v4 = vld [vmem:[#allocation5 + $0x2d8] sm:$0xff]  ;;  %v705_v6 = vpack.c.bf16 %v135_v62, %v131_v61  ;;  %v139_v7 = vld [vmem:[#allocation5 + $0x2c0] sm:$0xff]  ;;  %v833_v8 = vpack.c.bf16 %v137_v1, %v133_v63 }
  0x45   :  { %820 = vmatprep.subr.bf16.mxu1 %v819_v28  ;;  %v146_v5 = vld [vmem:[#allocation5 + $0x2f8] sm:$0xff]  ;;  %v707_v9 = vpack.c.bf16 %v144_v3, %v140_v2  ;;  %v143_v10 = vld [vmem:[#allocation5 + $0x2e0] sm:$0xff]  ;;  %v141_v11 = vld [vmem:[#allocation5 + $0x2d0] sm:$0xff] }
  0x46   :  { %v145_v12 = vld [vmem:[#allocation5 + $0x2f0] sm:$0xff]  ;;  %v835_v13 = vpack.c.bf16 %v146_v5, %v142_v4  ;;  %v148_v14 = vld [vmem:[#allocation5 + $0x308] sm:$0xff]  ;;  %v150_v17 = vld [vmem:[#allocation5 + $0x318] sm:$0xff]  ;;  %v709_v19 = vpack.c.bf16 %v143_v10, %v139_v7 }
  0x47   :  { %694 = vmatpush1.bf16.msra.mxu0 %v693_v34  ;;  %v152_v15 = vld [vmem:[#allocation5 + $0x328] sm:$0xff]  ;;  %v154_v18 = vld [vmem:[#allocation5 + $0x338] sm:$0xff]  ;;  %v837_v20 = vpack.c.bf16 %v145_v12, %v141_v11  ;;  %v147_v22 = vld [vmem:[#allocation5 + $0x300] sm:$0xff] }
  0x48   :  { %822 = vmatpush1.bf16.msra.mxu1 %v821_v35  ;;  %696 = vmatprep.subr.bf16.mxu0 %v695_v36  ;;  %v44_v16 = vld [vmem:[#allocation2 + $0x8] sm:$0xff]  ;;  %v711_v21 = vpack.c.bf16 %v152_v15, %v148_v14  ;;  %v151_v23 = vld [vmem:[#allocation5 + $0x320] sm:$0xff]  ;;  %v149_v24 = vld [vmem:[#allocation5 + $0x310] sm:$0xff]  ;;  %v839_v25 = vpack.c.bf16 %v154_v18, %v150_v17 }
  0x49   :  { %824 = vmatprep.subr.bf16.mxu1 %v823_v40  ;;  %393 = vmatprep.mubr.f32.mxu0 %v44_v16  ;;  %v153_v26 = vld [vmem:[#allocation5 + $0x330] sm:$0xff]  ;;  %v156_v27 = vld [vmem:[#allocation5 + $0x348] sm:$0xff]  ;;  %v158_v29 = vld [vmem:[#allocation5 + $0x358] sm:$0xff]  ;;  %v713_v31 = vpack.c.bf16 %v151_v23, %v147_v22 }
  0x4a   :  { %547 = vmatprep.mubr.f32.mxu1 %v44_v16  ;;  %v160_v28 = vld [vmem:[#allocation5 + $0x368] sm:$0xff]  ;;  %v162_v30 = vld [vmem:[#allocation5 + $0x378] sm:$0xff]  ;;  %v841_v32 = vpack.c.bf16 %v153_v26, %v149_v24  ;;  %v155_v34 = vld [vmem:[#allocation5 + $0x340] sm:$0xff] }
  0x4b   :  { %698 = vmatpush1.bf16.msra.mxu0 %v697_v46  ;;  %v715_v33 = vpack.c.bf16 %v160_v28, %v156_v27  ;;  %v159_v35 = vld [vmem:[#allocation5 + $0x360] sm:$0xff]  ;;  %v157_v36 = vld [vmem:[#allocation5 + $0x350] sm:$0xff]  ;;  %v843_v37 = vpack.c.bf16 %v162_v30, %v158_v29  ;;  %v164_v39 = vld [vmem:[#allocation5 + $0x388] sm:$0xff] }
  0x4c   :  { %826 = vmatpush1.bf16.msra.mxu1 %v825_v47  ;;  %700 = vmatprep.subr.bf16.mxu0 %v699_v48  ;;  %v161_v38 = vld [vmem:[#allocation5 + $0x370] sm:$0xff]  ;;  %v168_v40 = vld [vmem:[#allocation5 + $0x3a8] sm:$0xff]  ;;  %v166_v41 = vld [vmem:[#allocation5 + $0x398] sm:$0xff]  ;;  %v717_v43 = vpack.c.bf16 %v159_v35, %v155_v34 }
  0x4d   :  { %828 = vmatprep.subr.bf16.mxu1 %v827_v52  ;;  %v170_v42 = vld [vmem:[#allocation5 + $0x3b8] sm:$0xff]  ;;  %v845_v44 = vpack.c.bf16 %v161_v38, %v157_v36  ;;  %v719_v45 = vpack.c.bf16 %v168_v40, %v164_v39  ;;  %v163_v46 = vld [vmem:[#allocation5 + $0x380] sm:$0xff]  ;;  %v165_v48 = vld [vmem:[#allocation5 + $0x390] sm:$0xff] }
  0x4e   :  { %v167_v47 = vld [vmem:[#allocation5 + $0x3a0] sm:$0xff]  ;;  %v847_v49 = vpack.c.bf16 %v170_v42, %v166_v41  ;;  %v169_v50 = vld [vmem:[#allocation5 + $0x3b0] sm:$0xff]  ;;  %v172_v51 = vld [vmem:[#allocation5 + $0x3c8] sm:$0xff] }
  0x4f   :  { %702 = vmatpush1.bf16.msra.mxu0 %v701_v58  ;;  %v176_v52 = vld [vmem:[#allocation5 + $0x3e8] sm:$0xff]  ;;  %v174_v53 = vld [vmem:[#allocation5 + $0x3d8] sm:$0xff]  ;;  %v721_v55 = vpack.c.bf16 %v167_v47, %v163_v46  ;;  %v849_v56 = vpack.c.bf16 %v169_v50, %v165_v48  ;;  %v171_v58 = vld [vmem:[#allocation5 + $0x3c0] sm:$0xff] }
  0x50   :  { %830 = vmatpush1.bf16.msra.mxu1 %v829_v59  ;;  %704 = vmatprep.subr.bf16.mxu0 %v703_v60  ;;  %v178_v54 = vld [vmem:[#allocation5 + $0x3f8] sm:$0xff]  ;;  %v723_v57 = vpack.c.bf16 %v176_v52, %v172_v51  ;;  %v175_v59 = vld [vmem:[#allocation5 + $0x3e0] sm:$0xff]  ;;  %v173_v60 = vld [vmem:[#allocation5 + $0x3d0] sm:$0xff] }
  0x51   :  { %832 = vmatprep.subr.bf16.mxu1 %v831_v0  ;;  %v851_v61 = vpack.c.bf16 %v178_v54, %v174_v53  ;;  %v177_v62 = vld [vmem:[#allocation5 + $0x3f0] sm:$0xff]  ;;  %v180_v63 = vld [vmem:[#allocation5 + $0x408] sm:$0xff]  ;;  %v182_v1 = vld [vmem:[#allocation5 + $0x418] sm:$0xff]  ;;  %v725_v3 = vpack.c.bf16 %v175_v59, %v171_v58 }
  0x52   :  { %v184_v0 = vld [vmem:[#allocation5 + $0x428] sm:$0xff]  ;;  %v186_v2 = vld [vmem:[#allocation5 + $0x438] sm:$0xff]  ;;  %v853_v4 = vpack.c.bf16 %v177_v62, %v173_v60  ;;  %v183_v7 = vld [vmem:[#allocation5 + $0x420] sm:$0xff] }
  0x53   :  { %706 = vmatpush1.bf16.msra.mxu0 %v705_v6  ;;  %v727_v5 = vpack.c.bf16 %v184_v0, %v180_v63  ;;  %v179_v6 = vld [vmem:[#allocation5 + $0x400] sm:$0xff]  ;;  %v185_v10 = vld [vmem:[#allocation5 + $0x430] sm:$0xff]  ;;  %v188_v11 = vld [vmem:[#allocation5 + $0x448] sm:$0xff] }
  0x54   :  { %834 = vmatpush1.bf16.msra.mxu1 %v833_v8  ;;  %708 = vmatprep.subr.bf16.mxu0 %v707_v9  ;;  %v181_v8 = vld [vmem:[#allocation5 + $0x410] sm:$0xff]  ;;  %v855_v9 = vpack.c.bf16 %v186_v2, %v182_v1  ;;  %v192_v12 = vld [vmem:[#allocation5 + $0x468] sm:$0xff]  ;;  %v194_v14 = vld [vmem:[#allocation5 + $0x478] sm:$0xff]  ;;  %v729_v16 = vpack.c.bf16 %v183_v7, %v179_v6 }
  0x55   :  { %836 = vmatprep.subr.bf16.mxu1 %v835_v13  ;;  %v190_v13 = vld [vmem:[#allocation5 + $0x458] sm:$0xff]  ;;  %v43_v15 = vld [vmem:[#allocation2] sm:$0xff]  ;;  %v857_v17 = vpack.c.bf16 %v185_v10, %v181_v8  ;;  %v731_v18 = vpack.c.bf16 %v192_v12, %v188_v11  ;;  %v193_v23 = vld [vmem:[#allocation5 + $0x470] sm:$0xff] }
  0x56   :  { %v859_v22 = vpack.c.bf16 %v194_v14, %v190_v13  ;;  %v196_v24 = vld [vmem:[#allocation5 + $0x488] sm:$0xff]  ;;  %v198_v26 = vld [vmem:[#allocation5 + $0x498] sm:$0xff]  ;;  %v201_v35 = vld [vmem:[#allocation5 + $0x4b0] sm:$0xff] }
  0x57   :  { %710 = vmatpush1.bf16.msra.mxu0 %v709_v19  ;;  %v187_v19 = vld [vmem:[#allocation5 + $0x440] sm:$0xff]  ;;  %v202_v27 = vld [vmem:[#allocation5 + $0x4b8] sm:$0xff]  ;;  %v204_v36 = vld [vmem:[#allocation5 + $0x4c8] sm:$0xff] }
  0x58   :  { %838 = vmatpush1.bf16.msra.mxu1 %v837_v20  ;;  %712 = vmatprep.subr.bf16.mxu0 %v711_v21  ;;  %v191_v20 = vld [vmem:[#allocation5 + $0x460] sm:$0xff]  ;;  %v189_v21 = vld [vmem:[#allocation5 + $0x450] sm:$0xff]  ;;  %v863_v34 = vpack.c.bf16 %v202_v27, %v198_v26  ;;  %v206_v38 = vld [vmem:[#allocation5 + $0x4d8] sm:$0xff] }
  0x59   :  { %840 = vmatprep.subr.bf16.mxu1 %v839_v25  ;;  %v200_v25 = vld [vmem:[#allocation5 + $0x4a8] sm:$0xff]  ;;  %v733_v28 = vpack.c.bf16 %v191_v20, %v187_v19  ;;  %v861_v29 = vpack.c.bf16 %v193_v23, %v189_v21  ;;  %v210_v39 = vld [vmem:[#allocation5 + $0x4f8] sm:$0xff]  ;;  %v209_v47 = vld [vmem:[#allocation5 + $0x4f0] sm:$0xff] }
  0x5a   :  { %v735_v30 = vpack.c.bf16 %v200_v25, %v196_v24  ;;  %v867_v46 = vpack.c.bf16 %v210_v39, %v206_v38  ;;  %v212_v48 = vld [vmem:[#allocation5 + $0x508] sm:$0xff]  ;;  %v214_v50 = vld [vmem:[#allocation5 + $0x518] sm:$0xff]  ;;  %v217_v59 = vld [vmem:[#allocation5 + $0x530] sm:$0xff] }
  0x5b   :  { %714 = vmatpush1.bf16.msra.mxu0 %v713_v31  ;;  %v195_v31 = vld [vmem:[#allocation5 + $0x480] sm:$0xff]  ;;  %v218_v51 = vld [vmem:[#allocation5 + $0x538] sm:$0xff]  ;;  %v220_v60 = vld [vmem:[#allocation5 + $0x548] sm:$0xff] }
  0x5c   :  { %842 = vmatpush1.bf16.msra.mxu1 %v841_v32  ;;  %716 = vmatprep.subr.bf16.mxu0 %v715_v33  ;;  %v199_v32 = vld [vmem:[#allocation5 + $0x4a0] sm:$0xff]  ;;  %v197_v33 = vld [vmem:[#allocation5 + $0x490] sm:$0xff]  ;;  %v871_v58 = vpack.c.bf16 %v218_v51, %v214_v50  ;;  %v222_v62 = vld [vmem:[#allocation5 + $0x558] sm:$0xff] }
  0x5d   :  { %844 = vmatprep.subr.bf16.mxu1 %v843_v37  ;;  %v208_v37 = vld [vmem:[#allocation5 + $0x4e8] sm:$0xff]  ;;  %v737_v40 = vpack.c.bf16 %v199_v32, %v195_v31  ;;  %v865_v41 = vpack.c.bf16 %v201_v35, %v197_v33  ;;  %v226_v63 = vld [vmem:[#allocation5 + $0x578] sm:$0xff]  ;;  %v225_v7 = vld [vmem:[#allocation5 + $0x570] sm:$0xff] }
  0x5e   :  { %v739_v42 = vpack.c.bf16 %v208_v37, %v204_v36  ;;  %v875_v6 = vpack.c.bf16 %v226_v63, %v222_v62  ;;  %v228_v8 = vld [vmem:[#allocation5 + $0x588] sm:$0xff]  ;;  %v230_v10 = vld [vmem:[#allocation5 + $0x598] sm:$0xff]  ;;  %v227_v14 = vld [vmem:[#allocation5 + $0x580] sm:$0xff] }
  0x5f   :  { %718 = vmatpush1.bf16.msra.mxu0 %v717_v43  ;;  %v203_v43 = vld [vmem:[#allocation5 + $0x4c0] sm:$0xff]  ;;  %v234_v11 = vld [vmem:[#allocation5 + $0x5b8] sm:$0xff]  ;;  %v48_v12 = vld [vmem:[#allocation2 + $0x28] sm:$0xff] }
  0x60   :  { %846 = vmatpush1.bf16.msra.mxu1 %v845_v44  ;;  %720 = vmatprep.subr.bf16.mxu0 %v719_v45  ;;  %v207_v44 = vld [vmem:[#allocation5 + $0x4e0] sm:$0xff]  ;;  %v205_v45 = vld [vmem:[#allocation5 + $0x4d0] sm:$0xff]  ;;  %v879_v21 = vpack.c.bf16 %v234_v11, %v230_v10  ;;  %v240_v23 = vld [vmem:[#allocation5 + $0x5e8] sm:$0xff] }
  0x61   :  { %848 = vmatprep.subr.bf16.mxu1 %v847_v49  ;;  %v216_v49 = vld [vmem:[#allocation5 + $0x528] sm:$0xff]  ;;  %v741_v52 = vpack.c.bf16 %v207_v44, %v203_v43  ;;  %v869_v53 = vpack.c.bf16 %v209_v47, %v205_v45  ;;  %v229_v19 = vld [vmem:[#allocation5 + $0x590] sm:$0xff]  ;;  %v46_v24 = vld [vmem:[#allocation2 + $0x18] sm:$0xff] }
  0x62   :  { %v743_v54 = vpack.c.bf16 %v216_v49, %v212_v48  ;;  %v233_v20 = vld [vmem:[#allocation5 + $0x5b0] sm:$0xff]  ;;  %v238_v25 = vld [vmem:[#allocation5 + $0x5d8] sm:$0xff]  ;;  %v239_v31 = vld [vmem:[#allocation5 + $0x5e0] sm:$0xff] }
  0x63   :  { %722 = vmatpush1.bf16.msra.mxu0 %v721_v55  ;;  %v211_v55 = vld [vmem:[#allocation5 + $0x500] sm:$0xff]  ;;  %v242_v26 = vld [vmem:[#allocation5 + $0x5f8] sm:$0xff]  ;;  %v237_v32 = vld [vmem:[#allocation5 + $0x5d0] sm:$0xff] }
  0x64   :  { %850 = vmatpush1.bf16.msra.mxu1 %v849_v56  ;;  %724 = vmatprep.subr.bf16.mxu0 %v723_v57  ;;  %v215_v56 = vld [vmem:[#allocation5 + $0x520] sm:$0xff]  ;;  %v213_v57 = vld [vmem:[#allocation5 + $0x510] sm:$0xff]  ;;  %v883_v33 = vpack.c.bf16 %v242_v26, %v238_v25  ;;  %v244_v35 = vld [vmem:[#allocation5 + $0x608] sm:$0xff] }
  0x65   :  { %852 = vmatprep.subr.bf16.mxu1 %v851_v61  ;;  %v224_v61 = vld [vmem:[#allocation5 + $0x568] sm:$0xff]  ;;  %v745_v0 = vpack.c.bf16 %v215_v56, %v211_v55  ;;  %v873_v1 = vpack.c.bf16 %v217_v59, %v213_v57  ;;  %v246_v37 = vld [vmem:[#allocation5 + $0x618] sm:$0xff]  ;;  %v247_v43 = vld [vmem:[#allocation5 + $0x620] sm:$0xff] }
  0x66   :  { %v747_v2 = vpack.c.bf16 %v224_v61, %v220_v60  ;;  %v248_v36 = vld [vmem:[#allocation5 + $0x628] sm:$0xff]  ;;  %v250_v38 = vld [vmem:[#allocation5 + $0x638] sm:$0xff]  ;;  %v245_v44 = vld [vmem:[#allocation5 + $0x610] sm:$0xff] }
  0x67   :  { %726 = vmatpush1.bf16.msra.mxu0 %v725_v3  ;;  %v219_v3 = vld [vmem:[#allocation5 + $0x540] sm:$0xff]  ;;  %v887_v45 = vpack.c.bf16 %v250_v38, %v246_v37  ;;  %v252_v47 = vld [vmem:[#allocation5 + $0x648] sm:$0xff]  ;;  %v254_v49 = vld [vmem:[#allocation5 + $0x658] sm:$0xff] }
  0x68   :  { %854 = vmatpush1.bf16.msra.mxu1 %v853_v4  ;;  %728 = vmatprep.subr.bf16.mxu0 %v727_v5  ;;  %v223_v4 = vld [vmem:[#allocation5 + $0x560] sm:$0xff]  ;;  %v221_v5 = vld [vmem:[#allocation5 + $0x550] sm:$0xff]  ;;  %v256_v48 = vld [vmem:[#allocation5 + $0x668] sm:$0xff] }
  0x69   :  { %856 = vmatprep.subr.bf16.mxu1 %v855_v9  ;;  %v232_v9 = vld [vmem:[#allocation5 + $0x5a8] sm:$0xff]  ;;  %v749_v13 = vpack.c.bf16 %v223_v4, %v219_v3  ;;  %v258_v50 = vld [vmem:[#allocation5 + $0x678] sm:$0xff]  ;;  %v255_v55 = vld [vmem:[#allocation5 + $0x660] sm:$0xff] }
  0x6a   :  { %394 = vmatmul.mubr.f32.vlgmr.msra.gmra.mrb[0].mxu0 %v43_v15  ;;  %v253_v56 = vld [vmem:[#allocation5 + $0x650] sm:$0xff]  ;;  %v891_v57 = vpack.c.bf16 %v258_v50, %v254_v49  ;;  %v260_v59 = vld [vmem:[#allocation5 + $0x688] sm:$0xff]  ;;  %v262_v61 = vld [vmem:[#allocation5 + $0x698] sm:$0xff] }
  0x6b   :  { %730 = vmatpush1.bf16.msra.mxu0 %v729_v16  ;;  %548 = vmatmul.mubr.f32.vlgmr.msra.gmra.mrb[0].mxu1 %v43_v15  ;;  %v47_v15 = vld [vmem:[#allocation2 + $0x20] sm:$0xff]  ;;  %v877_v16 = vpack.c.bf16 %v225_v7, %v221_v5  ;;  %v264_v60 = vld [vmem:[#allocation5 + $0x6a8] sm:$0xff]  ;;  %v266_v62 = vld [vmem:[#allocation5 + $0x6b8] sm:$0xff] }
  0x6c   :  { %858 = vmatpush1.bf16.msra.mxu1 %v857_v17  ;;  %732 = vmatprep.subr.bf16.mxu0 %v731_v18  ;;  %v751_v17 = vpack.c.bf16 %v232_v9, %v228_v8  ;;  %v231_v18 = vld [vmem:[#allocation5 + $0x5a0] sm:$0xff]  ;;  %v261_v4 = vld [vmem:[#allocation5 + $0x690] sm:$0xff]  ;;  %v895_v5 = vpack.c.bf16 %v266_v62, %v262_v61  ;;  %v268_v7 = vld [vmem:[#allocation5 + $0x6c8] sm:$0xff] }
  0x6d   :  { %860 = vmatprep.subr.bf16.mxu1 %v859_v22  ;;  %399 = vmatprep.mubr.f32.mxu0 %v48_v12  ;;  %v236_v22 = vld [vmem:[#allocation5 + $0x5c8] sm:$0xff]  ;;  %v753_v27 = vpack.c.bf16 %v231_v18, %v227_v14  ;;  %v263_v3 = vld [vmem:[#allocation5 + $0x6a0] sm:$0xff]  ;;  %v270_v9 = vld [vmem:[#allocation5 + $0x6d8] sm:$0xff] }
  0x6e   :  { %553 = vmatprep.mubr.f32.mxu1 %v48_v12  ;;  %400 = vmatmul.mubr.f32.gmra.mrb[2].mxu0 %v47_v15  ;;  %v272_v8 = vld [vmem:[#allocation5 + $0x6e8] sm:$0xff]  ;;  %v274_v10 = vld [vmem:[#allocation5 + $0x6f8] sm:$0xff]  ;;  %v267_v14 = vld [vmem:[#allocation5 + $0x6c0] sm:$0xff] }
  0x6f   :  { %734 = vmatpush1.bf16.msra.mxu0 %v733_v28  ;;  %554 = vmatmul.mubr.f32.gmra.mrb[2].mxu1 %v47_v15  ;;  %v881_v28 = vpack.c.bf16 %v233_v20, %v229_v19  ;;  %v271_v15 = vld [vmem:[#allocation5 + $0x6e0] sm:$0xff]  ;;  %v273_v18 = vld [vmem:[#allocation5 + $0x6f0] sm:$0xff]  ;;  %v276_v19 = vld [vmem:[#allocation5 + $0x708] sm:$0xff] }
  0x70   :  { %862 = vmatpush1.bf16.msra.mxu1 %v861_v29  ;;  %736 = vmatprep.subr.bf16.mxu0 %v735_v30  ;;  %v755_v29 = vpack.c.bf16 %v240_v23, %v236_v22  ;;  %v235_v30 = vld [vmem:[#allocation5 + $0x5c0] sm:$0xff]  ;;  %v280_v20 = vld [vmem:[#allocation5 + $0x728] sm:$0xff]  ;;  %v282_v22 = vld [vmem:[#allocation5 + $0x738] sm:$0xff]  ;;  %v773_v23 = vpack.c.bf16 %v271_v15, %v267_v14 }
  0x71   :  { %864 = vmatprep.subr.bf16.mxu1 %v863_v34  ;;  %470 = vmatprep.mubr.f32.mxu0 %v46_v24  ;;  %v241_v34 = vld [vmem:[#allocation5 + $0x5f0] sm:$0xff]  ;;  %v757_v39 = vpack.c.bf16 %v239_v31, %v235_v30  ;;  %v775_v25 = vpack.c.bf16 %v280_v20, %v276_v19  ;;  %v275_v26 = vld [vmem:[#allocation5 + $0x700] sm:$0xff]  ;;  %v284_v31 = vld [vmem:[#allocation5 + $0x748] sm:$0xff] }
  0x72   :  { %624 = vmatprep.mubr.f32.mxu1 %v46_v24  ;;  %v281_v30 = vld [vmem:[#allocation5 + $0x730] sm:$0xff]  ;;  %v283_v38 = vld [vmem:[#allocation5 + $0x740] sm:$0xff] }
  0x73   :  { %738 = vmatpush1.bf16.msra.mxu0 %v737_v40  ;;  %v885_v40 = vpack.c.bf16 %v241_v34, %v237_v32  ;;  %v288_v32 = vld [vmem:[#allocation5 + $0x768] sm:$0xff]  ;;  %v290_v34 = vld [vmem:[#allocation5 + $0x778] sm:$0xff]  ;;  %v291_v50 = vld [vmem:[#allocation5 + $0x780] sm:$0xff] }
  0x74   :  { %866 = vmatpush1.bf16.msra.mxu1 %v865_v41  ;;  %740 = vmatprep.subr.bf16.mxu0 %v739_v42  ;;  %v759_v41 = vpack.c.bf16 %v248_v36, %v244_v35  ;;  %v243_v42 = vld [vmem:[#allocation5 + $0x600] sm:$0xff]  ;;  %v779_v37 = vpack.c.bf16 %v288_v32, %v284_v31 }
  0x75   :  { %868 = vmatprep.subr.bf16.mxu1 %v867_v46  ;;  %v249_v46 = vld [vmem:[#allocation5 + $0x630] sm:$0xff]  ;;  %v761_v51 = vpack.c.bf16 %v247_v43, %v243_v42  ;;  %v292_v43 = vld [vmem:[#allocation5 + $0x788] sm:$0xff]  ;;  %v299_v62 = vld [vmem:[#allocation5 + $0x7c0] sm:$0xff] }
  0x76   :  { %v289_v42 = vld [vmem:[#allocation5 + $0x770] sm:$0xff] }
  0x77   :  { %742 = vmatpush1.bf16.msra.mxu0 %v741_v52  ;;  %v889_v52 = vpack.c.bf16 %v249_v46, %v245_v44  ;;  %v296_v44 = vld [vmem:[#allocation5 + $0x7a8] sm:$0xff]  ;;  %v298_v46 = vld [vmem:[#allocation5 + $0x7b8] sm:$0xff] }
  0x78   :  { %870 = vmatpush1.bf16.msra.mxu1 %v869_v53  ;;  %744 = vmatprep.subr.bf16.mxu0 %v743_v54  ;;  %v763_v53 = vpack.c.bf16 %v256_v48, %v252_v47  ;;  %v251_v54 = vld [vmem:[#allocation5 + $0x640] sm:$0xff]  ;;  %v783_v49 = vpack.c.bf16 %v296_v44, %v292_v43 }
  0x79   :  { %872 = vmatprep.subr.bf16.mxu1 %v871_v58  ;;  %v257_v58 = vld [vmem:[#allocation5 + $0x670] sm:$0xff]  ;;  %v765_v63 = vpack.c.bf16 %v255_v55, %v251_v54  ;;  %v300_v55 = vld [vmem:[#allocation5 + $0x7c8] sm:$0xff] }
  0x7a   :  { %v297_v54 = vld [vmem:[#allocation5 + $0x7b0] sm:$0xff] }
  0x7b   :  { %746 = vmatpush1.bf16.msra.mxu0 %v745_v0  ;;  %v893_v0 = vpack.c.bf16 %v257_v58, %v253_v56  ;;  %v304_v56 = vld [vmem:[#allocation5 + $0x7e8] sm:$0xff]  ;;  %v306_v58 = vld [vmem:[#allocation5 + $0x7f8] sm:$0xff] }
  0x7c   :  { %874 = vmatpush1.bf16.msra.mxu1 %v873_v1  ;;  %748 = vmatprep.subr.bf16.mxu0 %v747_v2  ;;  %v767_v1 = vpack.c.bf16 %v264_v60, %v260_v59  ;;  %v259_v2 = vld [vmem:[#allocation5 + $0x680] sm:$0xff]  ;;  %v787_v61 = vpack.c.bf16 %v304_v56, %v300_v55 }
  0x7d   :  { %876 = vmatprep.subr.bf16.mxu1 %v875_v6  ;;  %v265_v6 = vld [vmem:[#allocation5 + $0x6b0] sm:$0xff]  ;;  %v769_v11 = vpack.c.bf16 %v263_v3, %v259_v2 }
  0x7e   :  { %v897_v12 = vpack.c.bf16 %v265_v6, %v261_v4  ;;  %v305_v2 = vld [vmem:[#allocation5 + $0x7f0] sm:$0xff]  ;;  %v50_v6 = vld [vmem:[#allocation2 + $0x38] sm:$0xff] }
  0x7f   :  { %750 = vmatpush1.bf16.msra.mxu0 %v749_v13  ;;  %v771_v13 = vpack.c.bf16 %v272_v8, %v268_v7  ;;  %v49_v7 = vld [vmem:[#allocation2 + $0x30] sm:$0xff]  ;;  %v309_v8 = vlaneseq }
  0x80   :  { %878 = vmatpush1.bf16.msra.mxu1 %v877_v16  ;;  %752 = vmatprep.subr.bf16.mxu0 %v751_v17  ;;  %v269_v16 = vld [vmem:[#allocation5 + $0x6d0] sm:$0xff]  ;;  %v899_v17 = vpack.c.bf16 %v274_v10, %v270_v9 }
  0x81   :  { %880 = vmatprep.subr.bf16.mxu1 %v879_v21  ;;  %v278_v21 = vld [vmem:[#allocation5 + $0x718] sm:$0xff]  ;;  %v901_v24 = vpack.c.bf16 %v273_v18, %v269_v16  ;;  %v310_v9 = vshrl.u32 %v309_v8, 7 }
  0x83   :  { %754 = vmatpush1.bf16.msra.mxu0 %v753_v27  ;;  %v279_v27 = vld [vmem:[#allocation5 + $0x720] sm:$0xff]  ;;  %v311_v10 = vsub.s32 0, %v310_v9  ;;  %v323_v14 = vsub.s32 3, %v310_v9 }
  0x84   :  { %882 = vmatpush1.bf16.msra.mxu1 %v881_v28  ;;  %756 = vmatprep.subr.bf16.mxu0 %v755_v29  ;;  %v277_v28 = vld [vmem:[#allocation5 + $0x710] sm:$0xff]  ;;  %v903_v29 = vpack.c.bf16 %v282_v22, %v278_v21  ;;  %v777_v35 = vpack.c.bf16 %v279_v27, %v275_v26 }
  0x85   :  { %884 = vmatprep.subr.bf16.mxu1 %v883_v33  ;;  %v286_v33 = vld [vmem:[#allocation5 + $0x758] sm:$0xff]  ;;  %v905_v36 = vpack.c.bf16 %v281_v30, %v277_v28 }
  0x87   :  { %758 = vmatpush1.bf16.msra.mxu0 %v757_v39  ;;  %v287_v39 = vld [vmem:[#allocation5 + $0x760] sm:$0xff] }
  0x88   :  { %886 = vmatpush1.bf16.msra.mxu1 %v885_v40  ;;  %760 = vmatprep.subr.bf16.mxu0 %v759_v41  ;;  %v285_v40 = vld [vmem:[#allocation5 + $0x750] sm:$0xff]  ;;  %v907_v41 = vpack.c.bf16 %v290_v34, %v286_v33  ;;  %v781_v47 = vpack.c.bf16 %v287_v39, %v283_v38 }
  0x89   :  { %888 = vmatprep.subr.bf16.mxu1 %v887_v45  ;;  %v294_v45 = vld [vmem:[#allocation5 + $0x798] sm:$0xff]  ;;  %v909_v48 = vpack.c.bf16 %v289_v42, %v285_v40 }
  0x8b   :  { %762 = vmatpush1.bf16.msra.mxu0 %v761_v51  ;;  %v295_v51 = vld [vmem:[#allocation5 + $0x7a0] sm:$0xff] }
  0x8c   :  { %890 = vmatpush1.bf16.msra.mxu1 %v889_v52  ;;  %764 = vmatprep.subr.bf16.mxu0 %v763_v53  ;;  %v293_v52 = vld [vmem:[#allocation5 + $0x790] sm:$0xff]  ;;  %v911_v53 = vpack.c.bf16 %v298_v46, %v294_v45  ;;  %v785_v59 = vpack.c.bf16 %v295_v51, %v291_v50 }
  0x8d   :  { %892 = vmatprep.subr.bf16.mxu1 %v891_v57  ;;  %v302_v57 = vld [vmem:[#allocation5 + $0x7d8] sm:$0xff]  ;;  %v913_v60 = vpack.c.bf16 %v297_v54, %v293_v52 }
  0x8f   :  { %766 = vmatpush1.bf16.msra.mxu0 %v765_v63  ;;  %v303_v63 = vld [vmem:[#allocation5 + $0x7e0] sm:$0xff] }
  0x90   :  { %894 = vmatpush1.bf16.msra.mxu1 %v893_v0  ;;  %768 = vmatprep.subr.bf16.mxu0 %v767_v1  ;;  %v915_v0 = vpack.c.bf16 %v306_v58, %v302_v57  ;;  %v301_v1 = vld [vmem:[#allocation5 + $0x7d0] sm:$0xff]  ;;  %v789_v3 = vpack.c.bf16 %v303_v63, %v299_v62 }
  0x91   :  { %896 = vmatprep.subr.bf16.mxu1 %v895_v5  ;;  %v917_v4 = vpack.c.bf16 %v305_v2, %v301_v1  ;;  %v45_v5 = vld [vmem:[#allocation2 + $0x10] sm:$0xff] }
  0x93   :  { %770 = vmatpush1.bf16.msra.mxu0 %v769_v11  ;;  %v307_v11 = vld [vmem:[%s1087_s2] sm:$0xf]  ;;  %s1016_s2 = smov [#allocation7]  }
  0x94   :  { %898 = vmatpush1.bf16.msra.mxu1 %v897_v12  ;;  %772 = vmatprep.subr.bf16.mxu0 %v771_v13  ;;  %v319_v12 = vsub.s32 2, %v310_v9  ;;  %v315_v13 = vsub.s32 1, %v310_v9  ;;  %v312_v15 = vrot.slane %v307_v11, %v311_v10  ;;  %v324_v18 = vrot.slane %v307_v11, %v323_v14  ;;  %s650_s11 = sshll.u32 %s1016_s2, 4  ;;  %s651_s11 = int_to_ptr.vmem [resolvable:$true] %s650_s11 }
  0x95   :  { %900 = vmatprep.subr.bf16.mxu1 %v899_v17  ;;  %s984_s12 = scalar_lea.vmem %s651_s11, 1024  ;;  %p989_p3 = scmp.lt.s32.totalorder %s651_s11, %s651_s11 }
  0x96   :  { %v320_v16 = vrot.slane %v307_v11, %v319_v12  ;;  %v316_v17 = vrot.slane %v307_v11, %v315_v13  ;;  %p985_p2 = scmp.ne.s32.totalorder %s651_s11, %s984_s12  ;;  %p990_p4 = scmp.lt.s32.totalorder %s984_s12, %s984_s12 }
  0x97   :  { %774 = vmatpush1.bf16.msra.mxu0 %v773_v23 }
  0x98   :  { %902 = vmatpush1.bf16.msra.mxu1 %v901_v24  ;;  %776 = vmatprep.subr.bf16.mxu0 %v775_v25  ;;  %p991_p5 = por %p990_p4, %p989_p3 }
  0x99   :  { %904 = vmatprep.subr.bf16.mxu1 %v903_v29 }
  0x9a   :  { %p992_p6 = pnand %p991_p5, %p985_p2 }
  0x9b   :  { %778 = vmatpush1.bf16.msra.mxu0 %v777_v35 }
  0x9c   :  { %906 = vmatpush1.bf16.msra.mxu1 %v905_v36  ;;  %780 = vmatprep.subr.bf16.mxu0 %v779_v37 }
  0x9d   :  { %908 = vmatprep.subr.bf16.mxu1 %v907_v41 }
  0x9f   :  { %782 = vmatpush1.bf16.msra.mxu0 %v781_v47 }
  0xa0   :  { %910 = vmatpush1.bf16.msra.mxu1 %v909_v48  ;;  %784 = vmatprep.subr.bf16.mxu0 %v783_v49 }
  0xa1   :  { %912 = vmatprep.subr.bf16.mxu1 %v911_v53 }
  0xa3   :  { %786 = vmatpush1.bf16.msra.mxu0 %v785_v59 }
  0xa4   :  { %914 = vmatpush1.bf16.msra.mxu1 %v913_v60  ;;  %788 = vmatprep.subr.bf16.mxu0 %v787_v61 }
  0xa5   :  { %916 = vmatprep.subr.bf16.mxu1 %v915_v0 }
  0xa7   :  { %790 = vmatpush1.bf16.msra.mxu0 %v789_v3 }
  0xa8   :  { %918 = vmatpush1.bf16.msra.mxu1 %v917_v4 }
  0xaa   :  { %471 = vmatmul.mubr.f32.vlgmr.msra.gmra.mrb[0].mxu0 %v45_v5 }
  0xab   :  { %625 = vmatmul.mubr.f32.vlgmr.msra.gmra.mrb[0].mxu1 %v45_v5  ;;  %476 = vmatprep.mubr.f32.mxu0 %v50_v6 }
  0xac   :  { %630 = vmatprep.mubr.f32.mxu1 %v50_v6 }
  0xae   :  { %477 = vmatmul.mubr.f32.gmra.mrb[2].mxu0 %v49_v7 }
  0xaf   :  { %631 = vmatmul.mubr.f32.gmra.mrb[2].mxu1 %v49_v7 }
 0x17d   :  { %v472_v19 = vpop.f32.mrb[0].mxu0 }
 0x17e   :  { %v919_v20 = vadd.f32 %v472_v19, %v312_v15  ;;  %v626_v21 = vpop.f32.mrb[0].mxu1  ;;  %v474_v22 = vpop.f32.mrb[1].mxu0 }
 0x17f   :  { %v923_v23 = vadd.f32 %v626_v21, %v320_v16  ;;  %v920_v24 = vadd.f32 %v474_v22, %v316_v17  ;;  %v628_v25 = vpop.f32.mrb[1].mxu1 }
 0x180   :  { %637 = vst [vmem:[#allocation7] sm:$0xff] %v919_v20  ;;  %v924_v26 = vadd.f32 %v628_v25, %v324_v18 }
 0x181   :  { %639 = vst [vmem:[#allocation7 + $0x10] sm:$0xff] %v923_v23  ;;  %638 = vst [vmem:[#allocation7 + $0x8] sm:$0xff] %v920_v24  ;;  %v478_v27 = vpop.f32.mrb[2].mxu0 }
 0x182   :  { %640 = vst [vmem:[#allocation7 + $0x18] sm:$0xff] %v924_v26  ;;  %v921_v28 = vadd.f32 %v478_v27, %v312_v15  ;;  %v632_v29 = vpop.f32.mrb[2].mxu1  ;;  %v480_v30 = vpop.f32.mrb[3].mxu0 }
 0x183   :  { %v925_v31 = vadd.f32 %v632_v29, %v320_v16  ;;  %v922_v32 = vadd.f32 %v480_v30, %v316_v17  ;;  %v634_v33 = vpop.f32.mrb[3].mxu1 }
 0x184   :  { %641 = vst [vmem:[#allocation7 + $0x20] sm:$0xff] %v921_v28  ;;  %v926_v34 = vadd.f32 %v634_v33, %v324_v18 }
 0x185   :  { %643 = vst [vmem:[#allocation7 + $0x30] sm:$0xff] %v925_v31  ;;  %642 = vst [vmem:[#allocation7 + $0x28] sm:$0xff] %v922_v32 }
 0x186   :  { %644 = vst [vmem:[#allocation7 + $0x38] sm:$0xff] %v926_v34 }
 0x187   :  { %995 = shalt.err (!%p992_p6)
}
 0x188   :  { %s996_s15 = scalar_lea.hbm %s1088_s3, 1024 }
 0x189   :  { %p997_p7 = scmp.ne.s32.totalorder %s1088_s3, %s996_s15  ;;  %p1000_p8 = scmp.lt.u32.totalorder %s996_s15, %s1088_s3 }
 0x18b   :  { %p1002_p9 = pnand %p1000_p8, %p997_p7 }
 0x18d   :  { %1005 = shalt.err (!%p1002_p9)
}
 0x18e   :  { %656 = dma.vmem_to_hbm [thread:$0]  %s651_s11, 1024, %s1088_s3, [#allocation4], %s1013_s22, %s1013_s22, %s1014_s23  }
 0x18f   :  { %1010 = dma.done.wait [#allocation4], 1024  }
 0x190   :  { %1011 = vsyncadd [#allocation4], 4294966272 }
 0x191   :  { %660 = vsyncpa [#allocation3], 1 }
 0x192   :  { %661 = vsyncpa [#allocation6], 1 }
 0x193   :  { %662 = vsyncpa [#allocation4], 1 }

</bundles_post_ra>
